<compile_context>
chip_gen: v7x
topology: tpu7x:2x2x1
jax: 0.10.0
libtpu: 0.0.40
codegen_flags: <defaults>
</compile_context>

<pallas_src>
import functools

import jax
import jax.numpy as jnp
from jax import lax
from jax.experimental import pallas as pl
from jax.experimental.pallas import tpu as pltpu

_C1 = 0.01 ** 2
_C2 = 0.03 ** 2


# --------------------------------------------------------------------------- #
# Fast path: kernel_size=3 / padding=1 ("same"-size output), roll-based pools.
# --------------------------------------------------------------------------- #
def _ssim3_kernel(x_ref, y_ref, out_ref):
    x = x_ref[...].astype(jnp.float32)
    y = y_ref[...].astype(jnp.float32)
    _, H, W = x.shape
    area = 9.0                       # 3 * 3
    c1p = _C1 * area * area          # fold 1/area: area cancels in ssim_n/ssim_d
    c2p = _C2 * area * area

    # Edge masks, hoisted once (JAX does not CSE broadcast_in_dim / iota).
    row = lax.broadcasted_iota(jnp.int32, x.shape, 1)
    col = lax.broadcasted_iota(jnp.int32, x.shape, 2)
    is_top, is_bot = row == 0, row == H - 1
    is_lft, is_rgt = col == 0, col == W - 1

    def vshift(a):
        # a[i-1] / a[i+1] with ReflectionPad2d(1) semantics at the borders.
        up = pltpu.roll(a, 1, axis=1)        # up[i] = a[i-1] (cyclic)
        dn = pltpu.roll(a, H - 1, axis=1)    # dn[i] = a[i+1] (cyclic)
        up_f = jnp.where(is_top, dn, up)     # row -1 -> row 1
        dn_f = jnp.where(is_bot, up, dn)     # row H  -> row H-2
        return up_f, dn_f

    def hsum(a):
        lf = pltpu.roll(a, 1, axis=2)        # lf[j] = a[j-1] (cyclic)
        rt = pltpu.roll(a, W - 1, axis=2)    # rt[j] = a[j+1] (cyclic)
        lf_f = jnp.where(is_lft, rt, lf)     # col -1 -> col 1
        rt_f = jnp.where(is_rgt, lf, rt)     # col W  -> col W-2
        return a + lf_f + rt_f

    x_u, x_d = vshift(x)
    y_u, y_d = vshift(y)

    # Vertical (row-direction) window sums.  Reuse the shifted x/y copies for
    # the product pools instead of shifting x*x / y*y / x*y themselves.
    vx = x + x_u + x_d
    vy = y + y_u + y_d
    vxx = x * x + x_u * x_u + x_d * x_d
    vyy = y * y + y_u * y_u + y_d * y_d
    vxy = x * y + x_u * y_u + x_d * y_d

    # Horizontal (column-direction) window sums -> raw 3x3 window sums.
    sx = hsum(vx)
    sy = hsum(vy)
    sxx = hsum(vxx)
    syy = hsum(vyy)
    sxy = hsum(vxy)

    # SSIM on raw window sums (area normalization folded into c1p/c2p).
    sxsy = sx * sy
    two_sxsy = sxsy + sxsy
    s2 = sx * sx + sy * sy
    n = (two_sxsy + c1p) * ((2.0 * area) * sxy - two_sxsy + c2p)
    d = (s2 + c1p) * (area * (sxx + syy) - s2 + c2p)
    # Exact divide kept for accuracy; switch to n * pl.reciprocal(d, approx=True)
    # only if the VALU slot is the measured bottleneck.
    out = 0.5 - 0.5 * (n / d)
    out_ref[...] = jnp.clip(out, 0.0, 1.0).astype(out_ref.dtype)


# --------------------------------------------------------------------------- #
# Generic path (any kernel_size / padding): original pad + slice formulation.
# --------------------------------------------------------------------------- #
def _refl_pad(a, p):
    if p == 0:
        return a
    H = a.shape[1]
    tops = [a[:, p - i:p - i + 1, :] for i in range(p)]          # rows p .. 1
    bots = [a[:, H - 2 - i:H - 1 - i, :] for i in range(p)]      # rows H-2 .. H-1-p
    a = jnp.concatenate(tops + [a] + bots, axis=1)
    W = a.shape[2]
    lefts = [a[:, :, p - i:p - i + 1] for i in range(p)]
    rights = [a[:, :, W - 2 - i:W - 1 - i] for i in range(p)]
    return jnp.concatenate(lefts + [a] + rights, axis=2)


def _pool_sum(a, k):
    _, Hp, Wp = a.shape
    Ho, Wo = Hp - k + 1, Wp - k + 1
    r = a[:, 0:Ho, :]
    for i in range(1, k):
        r = r + a[:, i:i + Ho, :]
    s = r[:, :, 0:Wo]
    for j in range(1, k):
        s = s + r[:, :, j:j + Wo]
    return s


def _ssim_generic_kernel(x_ref, y_ref, out_ref, *, ksize, pad):
    x = x_ref[...].astype(jnp.float32)
    y = y_ref[...].astype(jnp.float32)
    px = _refl_pad(x, pad)
    py = _refl_pad(y, pad)
    inv_area = 1.0 / float(ksize * ksize)
    mu_x = _pool_sum(px, ksize) * inv_area
    mu_y = _pool_sum(py, ksize) * inv_area
    sigma_x = _pool_sum(px * px, ksize) * inv_area - mu_x * mu_x
    sigma_y = _pool_sum(py * py, ksize) * inv_area - mu_y * mu_y
    sigma_xy = _pool_sum(px * py, ksize) * inv_area - mu_x * mu_y
    n = (2.0 * mu_x * mu_y + _C1) * (2.0 * sigma_xy + _C2)
    d = (mu_x * mu_x + mu_y * mu_y + _C1) * (sigma_x + sigma_y + _C2)
    out = (1.0 - n / d) * 0.5
    out_ref[...] = jnp.clip(out, 0.0, 1.0).astype(out_ref.dtype)


# --------------------------------------------------------------------------- #
# Wrapper.
# --------------------------------------------------------------------------- #
def _vmem_capacity_bytes():
    try:
        cap = getattr(pltpu.get_tpu_info(), "vmem_capacity_bytes", None)
        if cap:
            return int(cap)
    except Exception:
        pass
    return 64 << 20  # conservative (v7x per-TensorCore)


def ssim(x, y, kernel_size=3, padding=1):
    """SSIM loss map. x, y: (B, C, H, W) -> (B, C, Ho, Wo),
    Ho = H + 2*padding - kernel_size + 1 (== H for the default 3/1)."""
    assert x.shape == y.shape and x.ndim == 4
    B, C, H, W = x.shape
    Ho = H + 2 * padding - kernel_size + 1
    Wo = W + 2 * padding - kernel_size + 1
    BC = B * C

    # Leading-dim-only reshape: no data movement.
    x2 = x.reshape(BC, H, W)
    y2 = y.reshape(BC, H, W)

    fast = (kernel_size == 3 and padding == 1 and H >= 2 and W >= 2)

    # ---- tile (images per grid step) selection, generation-aware ------------
    vmem_cap = _vmem_capacity_bytes()
    # Kernel is HBM-bound: big tiles amortize the ~0.35us per-step cost, but the
    # fused body expands ~10-16x in f32 intermediates and v7x has only 64 MiB VMEM.
    budget = (4 << 20) if vmem_cap >= (100 << 20) else (1 << 20)
    per_img = H * W * x.dtype.itemsize

    max_tb = max(1, min(budget // per_img, BC))
    if BC >= 2:
        # Keep >= 2 grid steps so the "parallel" axis feeds both v7x TensorCores.
        max_tb = min(max_tb, (BC + 1) // 2)
    max_tb = max(1, max_tb)

    tb = 1
    for d in range(1, max_tb + 1):        # prefer an exact divisor (no tail padding)
        if BC % d == 0:
            tb = d
    if tb * 2 <= max_tb:                  # divisor path too small: cdiv + padded tail
        tb = max_tb
    steps = pl.cdiv(BC, tb)
    BCp = steps * tb
    if BCp != BC:
        zpad = jnp.zeros((BCp - BC, H, W), x2.dtype)
        x2 = jnp.concatenate([x2, zpad], axis=0)
        y2 = jnp.concatenate([y2, zpad], axis=0)
    # TODO(synk): add an H-tiled (1-row halo) path for single images bigger than
    # the VMEM budget (HD/4K frames) instead of whole-image blocks.
    # TODO(synk): when W << 128, pack images along the lane axis to avoid masked
    # vst.msk partial stores.

    # ---- explicit scoped-VMEM limit -----------------------------------------
    tile_in = tb * H * W * x.dtype.itemsize
    tile_out = tb * Ho * Wo * x.dtype.itemsize
    body_f32 = tb * max(H * W, Ho * Wo) * 4
    vmem_limit = 2 * 2 * tile_in + 2 * tile_out + 16 * body_f32 + (4 << 20)
    vmem_limit = int(min(max(vmem_limit, 32 << 20), int(0.75 * vmem_cap)))

    if fast:
        kernel = _ssim3_kernel
    else:
        kernel = functools.partial(_ssim_generic_kernel, ksize=kernel_size, pad=padding)

    out = pl.pallas_call(
        kernel,
        out_shape=jax.ShapeDtypeStruct((BCp, Ho, Wo), x.dtype),
        grid_spec=pltpu.PrefetchScalarGridSpec(
            num_scalar_prefetch=0,
            grid=(steps,),
            in_specs=[
                pl.BlockSpec((tb, H, W), lambda i: (i, 0, 0)),   # x
                pl.BlockSpec((tb, H, W), lambda i: (i, 0, 0)),   # y
            ],
            out_specs=pl.BlockSpec((tb, Ho, Wo), lambda i: (i, 0, 0)),
        ),
        compiler_params=pltpu.CompilerParams(
            dimension_semantics=("parallel",),
            vmem_limit_bytes=vmem_limit,
        ),
    )(x2, y2)

    if BCp != BC:
        out = out[:BC]
    return out.reshape(B, C, Ho, Wo)


# --------------------------------------------------------------------------- #
# Pure-JAX reference mirroring the PyTorch forward.
# --------------------------------------------------------------------------- #
def _ssim_ref(x, y, kernel_size=3, padding=1):
    pad = [(0, 0), (0, 0), (padding, padding), (padding, padding)]
    xp = jnp.pad(x, pad, mode="reflect")
    yp = jnp.pad(y, pad, mode="reflect")

    def avg_pool(a):
        s = lax.reduce_window(a, 0.0, lax.add,
                              (1, 1, kernel_size, kernel_size), (1, 1, 1, 1), "VALID")
        return s / float(kernel_size * kernel_size)

    mu_x, mu_y = avg_pool(xp), avg_pool(yp)
    sigma_x = avg_pool(xp * xp) - mu_x ** 2
    sigma_y = avg_pool(yp * yp) - mu_y ** 2
    sigma_xy = avg_pool(xp * yp) - mu_x * mu_y
    n = (2 * mu_x * mu_y + _C1) * (2 * sigma_xy + _C2)
    d = (mu_x ** 2 + mu_y ** 2 + _C1) * (sigma_x + sigma_y + _C2)
    return jnp.clip((1 - n / d) / 2, 0.0, 1.0)


if __name__ == "__main__":
    # W a multiple of 128 keeps the lane axis dense (typical camera widths are).
    B, C, H, W = 2, 3, 16, 256
    key = jax.random.PRNGKey(0)
    kx, ky = jax.random.split(key)

    x = jax.random.uniform(kx, (B, C, H, W), dtype=jnp.float32)
    y = jnp.clip(
        x + 0.1 * jax.random.normal(ky, (B, C, H, W), dtype=jnp.float32), 0.0, 1.0)

    out = jax.block_until_ready(ssim(x, y))
    assert out.shape == (B, C, H, W), out.shape

    ref = _ssim_ref(x, y)
    max_err = float(jnp.max(jnp.abs(out - ref)))
    assert max_err < 5e-5, max_err
    print("KERNEL_OK")
</pallas_src>

<mosaic_0001>
module attributes {stable_mosaic.version = 11 : i64} {
  func.func @_ssim3_kernel(%arg0: i32, %arg1: memref<3x16x256xf32, #tpu.memory_space<vmem>>, %arg2: memref<3x16x256xf32, #tpu.memory_space<vmem>>, %arg3: memref<3x16x256xf32, #tpu.memory_space<vmem>>) attributes {dimension_semantics = [#tpu.dimension_semantics<parallel>], iteration_bounds = array<i64: 2>, scalar_prefetch = 0 : i64, scratch_operands = 0 : i64, tpu.core_type = #tpu.core_type<tc>, window_params = [{transform_indices = @transform_0, window_bounds = array<i64: 3, 16, 256>}, {transform_indices = @transform_1, window_bounds = array<i64: 3, 16, 256>}, {transform_indices = @transform_2, window_bounds = array<i64: 3, 16, 256>}]} {
    %c0 = arith.constant 0 : index
    %c0_0 = arith.constant 0 : index
    %c0_1 = arith.constant 0 : index
    %0 = vector.load %arg1[%c0, %c0_0, %c0_1] : memref<3x16x256xf32, #tpu.memory_space<vmem>>, vector<3x16x256xf32>
    %c0_2 = arith.constant 0 : index
    %c0_3 = arith.constant 0 : index
    %c0_4 = arith.constant 0 : index
    %1 = vector.load %arg2[%c0_2, %c0_3, %c0_4] : memref<3x16x256xf32, #tpu.memory_space<vmem>>, vector<3x16x256xf32>
    %2 = tpu.iota {dimensions = array<i32: 1>} : vector<3x16x256xi32>
    %3 = tpu.iota {dimensions = array<i32: 2>} : vector<3x16x256xi32>
    %c0_i32 = arith.constant 0 : i32
    %4 = vector.broadcast %c0_i32 : i32 to vector<3x16x256xi32>
    %5 = arith.cmpi eq, %2, %4 : vector<3x16x256xi32>
    %c15_i32 = arith.constant 15 : i32
    %6 = vector.broadcast %c15_i32 : i32 to vector<3x16x256xi32>
    %7 = arith.cmpi eq, %2, %6 : vector<3x16x256xi32>
    %c0_i32_5 = arith.constant 0 : i32
    %8 = vector.broadcast %c0_i32_5 : i32 to vector<3x16x256xi32>
    %9 = arith.cmpi eq, %3, %8 : vector<3x16x256xi32>
    %c255_i32 = arith.constant 255 : i32
    %10 = vector.broadcast %c255_i32 : i32 to vector<3x16x256xi32>
    %11 = arith.cmpi eq, %3, %10 : vector<3x16x256xi32>
    %c1_i32 = arith.constant 1 : i32
    %12 = tpu.dynamic_rotate %0 by %c1_i32 dim 1 : vector<3x16x256xf32>, i32 -> vector<3x16x256xf32>
    %c15_i32_6 = arith.constant 15 : i32
    %13 = tpu.dynamic_rotate %0 by %c15_i32_6 dim 1 : vector<3x16x256xf32>, i32 -> vector<3x16x256xf32>
    %14 = arith.select %5, %13, %12 : vector<3x16x256xi1>, vector<3x16x256xf32>
    %15 = arith.select %7, %12, %13 : vector<3x16x256xi1>, vector<3x16x256xf32>
    %c1_i32_7 = arith.constant 1 : i32
    %16 = tpu.dynamic_rotate %1 by %c1_i32_7 dim 1 : vector<3x16x256xf32>, i32 -> vector<3x16x256xf32>
    %c15_i32_8 = arith.constant 15 : i32
    %17 = tpu.dynamic_rotate %1 by %c15_i32_8 dim 1 : vector<3x16x256xf32>, i32 -> vector<3x16x256xf32>
    %18 = arith.select %5, %17, %16 : vector<3x16x256xi1>, vector<3x16x256xf32>
    %19 = arith.select %7, %16, %17 : vector<3x16x256xi1>, vector<3x16x256xf32>
    %20 = arith.addf %0, %14 : vector<3x16x256xf32>
    %21 = arith.addf %20, %15 : vector<3x16x256xf32>
    %22 = arith.addf %1, %18 : vector<3x16x256xf32>
    %23 = arith.addf %22, %19 : vector<3x16x256xf32>
    %24 = arith.mulf %0, %0 : vector<3x16x256xf32>
    %25 = arith.mulf %14, %14 : vector<3x16x256xf32>
    %26 = arith.addf %24, %25 : vector<3x16x256xf32>
    %27 = arith.mulf %15, %15 : vector<3x16x256xf32>
    %28 = arith.addf %26, %27 : vector<3x16x256xf32>
    %29 = arith.mulf %1, %1 : vector<3x16x256xf32>
    %30 = arith.mulf %18, %18 : vector<3x16x256xf32>
    %31 = arith.addf %29, %30 : vector<3x16x256xf32>
    %32 = arith.mulf %19, %19 : vector<3x16x256xf32>
    %33 = arith.addf %31, %32 : vector<3x16x256xf32>
    %34 = arith.mulf %0, %1 : vector<3x16x256xf32>
    %35 = arith.mulf %14, %18 : vector<3x16x256xf32>
    %36 = arith.addf %34, %35 : vector<3x16x256xf32>
    %37 = arith.mulf %15, %19 : vector<3x16x256xf32>
    %38 = arith.addf %36, %37 : vector<3x16x256xf32>
    %c1_i32_9 = arith.constant 1 : i32
    %39 = tpu.dynamic_rotate %21 by %c1_i32_9 dim 2 : vector<3x16x256xf32>, i32 -> vector<3x16x256xf32>
    %c255_i32_10 = arith.constant 255 : i32
    %40 = tpu.dynamic_rotate %21 by %c255_i32_10 dim 2 : vector<3x16x256xf32>, i32 -> vector<3x16x256xf32>
    %41 = arith.select %9, %40, %39 : vector<3x16x256xi1>, vector<3x16x256xf32>
    %42 = arith.select %11, %39, %40 : vector<3x16x256xi1>, vector<3x16x256xf32>
    %43 = arith.addf %21, %41 : vector<3x16x256xf32>
    %44 = arith.addf %43, %42 : vector<3x16x256xf32>
    %c1_i32_11 = arith.constant 1 : i32
    %45 = tpu.dynamic_rotate %23 by %c1_i32_11 dim 2 : vector<3x16x256xf32>, i32 -> vector<3x16x256xf32>
    %c255_i32_12 = arith.constant 255 : i32
    %46 = tpu.dynamic_rotate %23 by %c255_i32_12 dim 2 : vector<3x16x256xf32>, i32 -> vector<3x16x256xf32>
    %47 = arith.select %9, %46, %45 : vector<3x16x256xi1>, vector<3x16x256xf32>
    %48 = arith.select %11, %45, %46 : vector<3x16x256xi1>, vector<3x16x256xf32>
    %49 = arith.addf %23, %47 : vector<3x16x256xf32>
    %50 = arith.addf %49, %48 : vector<3x16x256xf32>
    %c1_i32_13 = arith.constant 1 : i32
    %51 = tpu.dynamic_rotate %28 by %c1_i32_13 dim 2 : vector<3x16x256xf32>, i32 -> vector<3x16x256xf32>
    %c255_i32_14 = arith.constant 255 : i32
    %52 = tpu.dynamic_rotate %28 by %c255_i32_14 dim 2 : vector<3x16x256xf32>, i32 -> vector<3x16x256xf32>
    %53 = arith.select %9, %52, %51 : vector<3x16x256xi1>, vector<3x16x256xf32>
    %54 = arith.select %11, %51, %52 : vector<3x16x256xi1>, vector<3x16x256xf32>
    %55 = arith.addf %28, %53 : vector<3x16x256xf32>
    %56 = arith.addf %55, %54 : vector<3x16x256xf32>
    %c1_i32_15 = arith.constant 1 : i32
    %57 = tpu.dynamic_rotate %33 by %c1_i32_15 dim 2 : vector<3x16x256xf32>, i32 -> vector<3x16x256xf32>
    %c255_i32_16 = arith.constant 255 : i32
    %58 = tpu.dynamic_rotate %33 by %c255_i32_16 dim 2 : vector<3x16x256xf32>, i32 -> vector<3x16x256xf32>
    %59 = arith.select %9, %58, %57 : vector<3x16x256xi1>, vector<3x16x256xf32>
    %60 = arith.select %11, %57, %58 : vector<3x16x256xi1>, vector<3x16x256xf32>
    %61 = arith.addf %33, %59 : vector<3x16x256xf32>
    %62 = arith.addf %61, %60 : vector<3x16x256xf32>
    %c1_i32_17 = arith.constant 1 : i32
    %63 = tpu.dynamic_rotate %38 by %c1_i32_17 dim 2 : vector<3x16x256xf32>, i32 -> vector<3x16x256xf32>
    %c255_i32_18 = arith.constant 255 : i32
    %64 = tpu.dynamic_rotate %38 by %c255_i32_18 dim 2 : vector<3x16x256xf32>, i32 -> vector<3x16x256xf32>
    %65 = arith.select %9, %64, %63 : vector<3x16x256xi1>, vector<3x16x256xf32>
    %66 = arith.select %11, %63, %64 : vector<3x16x256xi1>, vector<3x16x256xf32>
    %67 = arith.addf %38, %65 : vector<3x16x256xf32>
    %68 = arith.addf %67, %66 : vector<3x16x256xf32>
    %69 = arith.mulf %44, %50 : vector<3x16x256xf32>
    %70 = arith.addf %69, %69 : vector<3x16x256xf32>
    %71 = arith.mulf %44, %44 : vector<3x16x256xf32>
    %72 = arith.mulf %50, %50 : vector<3x16x256xf32>
    %73 = arith.addf %71, %72 : vector<3x16x256xf32>
    %cst = arith.constant 8.100000e-03 : f32
    %74 = vector.broadcast %cst : f32 to vector<3x16x256xf32>
    %75 = arith.addf %70, %74 : vector<3x16x256xf32>
    %cst_19 = arith.constant 1.800000e+01 : f32
    %76 = vector.broadcast %cst_19 : f32 to vector<3x16x256xf32>
    %77 = arith.mulf %76, %68 : vector<3x16x256xf32>
    %78 = arith.subf %77, %70 : vector<3x16x256xf32>
    %cst_20 = arith.constant 7.290000e-02 : f32
    %79 = vector.broadcast %cst_20 : f32 to vector<3x16x256xf32>
    %80 = arith.addf %78, %79 : vector<3x16x256xf32>
    %81 = arith.mulf %75, %80 : vector<3x16x256xf32>
    %cst_21 = arith.constant 8.100000e-03 : f32
    %82 = vector.broadcast %cst_21 : f32 to vector<3x16x256xf32>
    %83 = arith.addf %73, %82 : vector<3x16x256xf32>
    %84 = arith.addf %56, %62 : vector<3x16x256xf32>
    %cst_22 = arith.constant 9.000000e+00 : f32
    %85 = vector.broadcast %cst_22 : f32 to vector<3x16x256xf32>
    %86 = arith.mulf %85, %84 : vector<3x16x256xf32>
    %87 = arith.subf %86, %73 : vector<3x16x256xf32>
    %cst_23 = arith.constant 7.290000e-02 : f32
    %88 = vector.broadcast %cst_23 : f32 to vector<3x16x256xf32>
    %89 = arith.addf %87, %88 : vector<3x16x256xf32>
    %90 = arith.mulf %83, %89 : vector<3x16x256xf32>
    %91 = arith.divf %81, %90 : vector<3x16x256xf32>
    %cst_24 = arith.constant 5.000000e-01 : f32
    %92 = vector.broadcast %cst_24 : f32 to vector<3x16x256xf32>
    %93 = arith.mulf %92, %91 : vector<3x16x256xf32>
    %cst_25 = arith.constant 5.000000e-01 : f32
    %94 = vector.broadcast %cst_25 : f32 to vector<3x16x256xf32>
    %95 = arith.subf %94, %93 : vector<3x16x256xf32>
    %cst_26 = arith.constant 0.000000e+00 : f32
    %cst_27 = arith.constant 1.000000e+00 : f32
    %96 = vector.broadcast %cst_26 : f32 to vector<3x16x256xf32>
    %97 = arith.maximumf %96, %95 : vector<3x16x256xf32>
    %98 = vector.broadcast %cst_27 : f32 to vector<3x16x256xf32>
    %99 = arith.minimumf %98, %97 : vector<3x16x256xf32>
    %c0_28 = arith.constant 0 : index
    %c0_29 = arith.constant 0 : index
    %c0_30 = arith.constant 0 : index
    %100 = vector.load %arg3[%c0_28, %c0_29, %c0_30] : memref<3x16x256xf32, #tpu.memory_space<vmem>>, vector<3x16x256xf32>
    tpu.vector_store %arg3[%c0_28, %c0_29, %c0_30], %99 {strides = array<i32>} : memref<3x16x256xf32, #tpu.memory_space<vmem>>, vector<3x16x256xf32>,
    return
  }
  func.func @transform_0(%arg0: i32) -> (i32, i32, i32) {
    %c0_i32 = arith.constant 0 : i32
    %c0_i32_0 = arith.constant 0 : i32
    %c0_i32_1 = arith.constant 0 : i32
    return %arg0, %c0_i32, %c0_i32_0 : i32, i32, i32
  }
  func.func @transform_1(%arg0: i32) -> (i32, i32, i32) {
    %c0_i32 = arith.constant 0 : i32
    %c0_i32_0 = arith.constant 0 : i32
    %c0_i32_1 = arith.constant 0 : i32
    return %arg0, %c0_i32, %c0_i32_0 : i32, i32, i32
  }
  func.func @transform_2(%arg0: i32) -> (i32, i32, i32) {
    %c0_i32 = arith.constant 0 : i32
    %c0_i32_0 = arith.constant 0 : i32
    %c0_i32_1 = arith.constant 0 : i32
    return %arg0, %c0_i32, %c0_i32_0 : i32, i32, i32
  }
}

</mosaic_0001>

<bundles_post_ra>
// kernel: tpu_custom_call.1
= control target key start
LH: loop header
LB: loop body
LE: loop exit
PB: predicated region body
PF: predicated region fallthrough
CT: control target
= control target key end

     0   :  { %7 = vsyncpa [#allocation3], 0  ;;  %s4122_s0 = inlined_call_operand.hbm [shape: f32[6,16,256], index: 0, kind: input, shape index: {}]   ;;  %s4123_s1 = inlined_call_operand.hbm [shape: f32[6,16,256], index: 1, kind: input, shape index: {}]   ;;  %s4124_s2 = inlined_call_operand.hbm [shape: f32[6,16,256], index: 2, kind: output, shape index: {}]  }
   0x1   :  { %9 = vsyncpa [#allocation3 + $0x1], 0 }
   0x2   :  { %10 = vsyncpa [#allocation6], 0 }
   0x3   :  { %12 = vsyncpa [#allocation6 + $0x1], 0 }
   0x4   :  { %13 = vsyncpa [#allocation4], 0 }
   0x5   :  { %15 = vsyncpa [#allocation4 + $0x1], 0  ;;  %s1869_s9 = smov 0   ;;  %s1871_s10 = smov 0  }
   0x6   :  { %s1873_s11 = smov 0   ;;  %s1875_s12 = smov 0  }
   0x7 LB: > { %s1890_s13 = sadd.s32 4294967295, %s1843_s12   ;;  %s1608_s14 = sadd.s32 4294967294, %s1843_s12   ;;  %s1843_s12 = sphi %s1875_s12, %s4498_s12   ;;  %s1839_s11 = sphi %s1873_s11, %s4497_s11   ;;  %s1835_s10 = sphi %s1871_s10, %s4496_s10   ;;  %s1831_s9 = sphi %s1869_s9, %s4495_s9  }
   0x8   : > { %s1894_s15 = sadd.s32 1, %s1843_s12   ;;  %s28_s16 = sadd.s32 1, %s1839_s11 }
   0x9   : > { %s25_s17 = ssub.s32 %s1843_s12, %s1894_s15  ;;  %p35_p0 = scmp.ne.s32.totalorder %s1839_s11, %s1835_s10 }
   0xa   : > { %p26_p1 = scmp.eq.s32.totalorder %s25_s17, 0  ;;  %p36_p2 = scmp.eq.s32.totalorder %s1843_s12, 0 }
   0xb   : > { %p41_p3 = scmp.ne.s32.totalorder %s1835_s10, %s1831_s9  ;;  %p42_p4 = scmp.eq.s32.totalorder %s1890_s13, 0 }
   0xc   : > { %s1906_s18 = scalar_select %p26_p1, %s1839_s11, %s28_s16  }
   0xd   : > { %p37_p5 = por %p36_p2, %p35_p0  ;;  %p1908_p6 = por %p42_p4, %p41_p3 }
   0xe   : > { %p91_p7 = scmp.eq.s32.totalorder %s1890_s13, 1  ;;  %p97_p8 = scmp.eq.s32.totalorder %s1608_s14, 1 }
   0xf   : > { %s4249_s19 = scalar_select %p1908_p6, 1, 0 }
  0x10   : > { %p1649_p10 = scmp.lt.s32.totalorder %s1843_s12, 2  ;;  %p1915_p11 = por %p91_p7, %p35_p0 }
  0x11   : > { %p1919_p12 = por %p97_p8, %p41_p3  ;;  %s1924_s22 = sand.u32 1, %s1839_s11  }
  0x12   : > { %s4250_s20 = scalar_select %p1915_p11, 1, 0 }
  0x13   : > { %s4251_s21 = scalar_select %p1919_p12, 1, 0 }
  0x14   : > { %s1626_s23 = smul.u32 1536, %s1843_s12  ;;  %p1935_p13 = pnand %p1649_p10, %p37_p5 }
  0x15   : > { %s1629_s24 = smul.u32 96, %s1924_s22  ;;  %s118_s3 = scalar_lea.sflag [#allocation3], %s1924_s22 }
  0x16   : > { %s1933_s27 = scalar_lea.hbm %s4122_s0, %s1626_s23  ;;  %p1715_p1 = pneg %p1935_p13 }
  0x17   : > { %s121_s29 = scalar_lea.vmem [#allocation2], %s1629_s24  ;;  %s1713_s4 = scalar_lea.hbm %s1933_s27, 1536 }
  0x18   : > { %s129_s30 = sshll.u32 %s121_s29, 4  ;;  %p1714_p0 = scmp.ne.s32.totalorder %s1933_s27, %s1713_s4  ;;  %s1941_s30 = int_to_ptr.vmem [resolvable:$true] %s129_s30 }
  0x19   : > { %s1718_s7 = scalar_lea.hbm %s4122_s0, 3072  ;;  %p1719_p4 = scmp.lt.u32.totalorder %s1933_s27, %s4122_s0 }
  0x1a   : > { %p1716_p2 = pnand %p1715_p1, %p1714_p0  ;;  %p1720_p5 = scmp.lt.u32.totalorder %s1718_s7, %s1713_s4 }
  0x1b   : > { %p1722_p8 = scmp.lt.u32.totalorder %s1713_s4, %s1933_s27 }
  0x1c   : > { %p1717_p3 = pneg %p1716_p2  ;;  %p1721_p7 = por %p1720_p5, %p1719_p4 }
  0x1e   : > { %p1723_p10 = por %p1722_p8, %p1721_p7 }
  0x20   : > { %p1724_p9 = pnand %p1723_p10, %p1717_p3 }
  0x22   : > { %1727 = shalt.err (!%p1724_p9)
}
  0x23   : > { %s1728_s16 = scalar_lea.vmem %s1941_s30, 1536  ;;  %s1845_s17 = smov [#allocation2]  }
  0x24   : > { %p1729_p0 = scmp.ne.s32.totalorder %s1941_s30, %s1728_s16  ;;  %s1733_s25 = sshll.u32 %s1845_s17, 4  ;;  %s1734_s25 = int_to_ptr.vmem [resolvable:$false] %s1733_s25 }
  0x25   : > { %s1735_s26 = scalar_lea.vmem %s1734_s25, 3072  ;;  %p1736_p11 = scmp.lt.s32.totalorder %s1941_s30, %s1734_s25 }
  0x26   : > { %p1731_p2 = pnand %p1729_p0, %p1715_p1  ;;  %p1737_p4 = scmp.lt.s32.totalorder %s1735_s26, %s1728_s16 }
  0x28   : > { %p1732_p12 = pneg %p1731_p2  ;;  %p1738_p5 = por %p1737_p4, %p1736_p11 }
  0x2a   : > { %p1739_p7 = pnand %p1738_p5, %p1732_p12 }
  0x2c   : > { %1742 = shalt.err (!%p1739_p7)
}
  0x2d   : > { %s1846_s29 = smov 256   ;;  %s1847_s4 = smov 16  }
  0x2e   : > { %1641 = dma.hbm_to_vmem [thread:$0]  (!%p1935_p13), %s1933_s27, 1536, %s1941_s30, %s118_s3, %s1846_s29, %s1846_s29, %s1847_s4  }
  0x2f   : > { %p1615_p9 = scmp.ge.s32.totalorder %s1843_s12, 1  ;;  %p159_p11 = scmp.lt.s32.totalorder %s1843_s12, 3 }
  0x30   : > { %s1985_s8 = scalar_lea.hbm %s4123_s1, %s1626_s23  ;;  %s143_s14 = scalar_lea.vmem [#allocation5], %s1629_s24 }
  0x31   : > { %p1976_p12 = pnand %p1615_p9, %p159_p11  ;;  %s151_s16 = sshll.u32 %s143_s14, 4  ;;  %s1989_s16 = int_to_ptr.vmem [resolvable:$true] %s151_s16 }
  0x32   : > { %s140_s27 = scalar_lea.sflag [#allocation6], %s1924_s22  ;;  %s1743_s30 = scalar_lea.hbm %s1985_s8, 1536 }
  0x33   : > { %p1744_p3 = scmp.ne.s32.totalorder %s1985_s8, %s1743_s30  ;;  %s1748_s23 = scalar_lea.hbm %s4123_s1, 3072 }
  0x34   : > { %p1749_p0 = scmp.lt.u32.totalorder %s1985_s8, %s4123_s1  ;;  %p1750_p2 = scmp.lt.u32.totalorder %s1748_s23, %s1743_s30 }
  0x35   : > { %p1746_p8 = pnand %p1744_p3, %p1715_p1  ;;  %p1752_p5 = scmp.lt.u32.totalorder %s1743_s30, %s1985_s8 }
  0x36   : > { %p1751_p4 = por %p1750_p2, %p1749_p0 }
  0x37   : > { %p1747_p10 = pneg %p1746_p8 }
  0x38   : > { %p1753_p7 = por %p1752_p5, %p1751_p4 }
  0x3a   : > { %p1754_p9 = pnand %p1753_p7, %p1747_p10 }
  0x3c   : > { %1757 = shalt.err (!%p1754_p9)
}
  0x3d   : > { %s1758_s24 = scalar_lea.vmem %s1989_s16, 1536  ;;  %s1848_s6 = smov [#allocation5]  }
  0x3e   : > { %p1759_p11 = scmp.ne.s32.totalorder %s1989_s16, %s1758_s24  ;;  %s1763_s7 = sshll.u32 %s1848_s6, 4  ;;  %s1764_s7 = int_to_ptr.vmem [resolvable:$false] %s1763_s7 }
  0x3f   : > { %s1765_s14 = scalar_lea.vmem %s1764_s7, 3072  ;;  %p1766_p6 = scmp.lt.s32.totalorder %s1989_s16, %s1764_s7 }
  0x40   : > { %p1761_p3 = pnand %p1759_p11, %p1715_p1  ;;  %p1767_p0 = scmp.lt.s32.totalorder %s1765_s14, %s1758_s24 }
  0x42   : > { %p1762_p8 = pneg %p1761_p3  ;;  %p1768_p2 = por %p1767_p0, %p1766_p6 }
  0x44   : > { %p1769_p4 = pnand %p1768_p2, %p1762_p8 }
  0x46   : > { %1772 = shalt.err (!%p1769_p4)
}
  0x47   : > { %1644 = dma.hbm_to_vmem [thread:$0]  (!%p1935_p13), %s1985_s8, 1536, %s1989_s16, %s140_s27, %s1846_s29, %s1846_s29, %s1847_s4  }
  0x48   : > { %163 = sbr.rel (%p1976_p12) target bundleno = 507 (0x1fb), region = 28 }
  0x4f   : > { %s2023_s30 = sand.u32 1, %s1835_s10   ;;  %p4254_p6 = scmp.ne.s32.totalorder %s4249_s19, 0 }
  0x50   : > { %s2026_s3 = smul.u32 96, %s2023_s30  ;;  %s166_s28 = scalar_lea.sflag [#allocation3], %s2023_s30 }
  0x52   : > { %s2030_s17 = scalar_lea.vmem [#allocation2], %s2026_s3 }
  0x53   : > { %1818 = dma.done.wait (%p4254_p6), %s166_s28, 1536  }
  0x54   : > { %1820 = vsyncadd (%p4254_p6), %s166_s28, 4294965760  ;;  %s175_s22 = scalar_lea.sflag [#allocation6], %s2023_s30  ;;  %s2038_s29 = scalar_lea.vmem [#allocation5], %s2026_s3 }
  0x55   : > { %1822 = dma.done.wait (%p4254_p6), %s175_s22, 1536  }
  0x56   : > { %1824 = vsyncadd (%p4254_p6), %s175_s22, 4294965760  ;;  %v4127_v0 = vlaneseq  ;;  %v2052_v3 = vld [vmem:[%s2030_s17 + $0x20] sm:$0xff]  ;;  %v2055_v4 = vld [vmem:[%s2030_s17 + $0x30] sm:$0xff]  ;;  %s1849_s19 = smov 1   ;;  %s1850_s4 = smov 127  }
  0x57   : > { %4255 = vst [vmem:[#allocation11_spill] sm:$0xff] %v2052_v3  ;;  %4256 = vst [vmem:[#allocation12_spill] sm:$0xff] %v2055_v4  ;;  %v2060_v5 = vld [vmem:[%s2030_s17] sm:$0xff]  ;;  %v247_v6 = vrot.slane %v2052_v3, 7  ;;  %v253_v7 = vrot.slane %v2055_v4, 7  ;;  %v272_v8 = vrot.slane %v2052_v3, 1 }
  0x58   : > { %v2045_v1 = vshrl.u32 %v4127_v0, 7  ;;  %v278_v9 = vrot.slane %v2055_v4, 1  ;;  %v2068_v10 = vld [vmem:[%s2030_s17 + $0x10] sm:$0xff]  ;;  %v2071_v11 = vld [vmem:[%s2030_s17 + $0x40] sm:$0xff]  ;;  %v245_v12 = vrot.slane %v2060_v5, 7  ;;  %v270_v14 = vrot.slane %v2060_v5, 1 }
  0x59   : > { %4257 = vst [vmem:[#allocation13_spill] sm:$0xff] %v2071_v11  ;;  %v251_v13 = vrot.slane %v2068_v10, 7  ;;  %v276_v15 = vrot.slane %v2068_v10, 1  ;;  %v2078_v16 = vld [vmem:[%s2030_s17 + $0x50] sm:$0xff]  ;;  %v249_v19 = vrot.slane %v2071_v11, 7  ;;  %v2110_v25 = vld [vmem:[%s2030_s17 + $0x8] sm:$0xff] }
  0x5a   : > { %v2048_v2 = vadd.s32 8, %v2045_v1  ;;  %vm257_vm0 = vcmp.lt.s32.totalorder %v2045_v1, 1  ;;  %vm282_vm2 = vcmp.lt.s32.totalorder %v2045_v1, 7  ;;  %vm237_vm3 = vcmp.eq.s32.totalorder %v2045_v1, 0  ;;  %4258 = vst [vmem:[#allocation14_spill] sm:$0xff] %v2078_v16  ;;  %4261 = vst [vmem:[#allocation17_spill] sm:$0xff] %v2110_v25 }
  0x5b   : > { %v2086_v17 = vsel %vm257_vm0, %v247_v6, %v253_v7  ;;  %v291_v18 = vsel %vm282_vm2, %v278_v9, %v272_v8  ;;  %v255_v20 = vrot.slane %v2078_v16, 7  ;;  %v2105_v23 = vsel %vm257_vm0, %v245_v12, %v251_v13  ;;  %v2113_v26 = vld [vmem:[%s2030_s17 + $0x18] sm:$0xff]  ;;  %v2156_v43 = vld [vmem:[%s2030_s17 + $0x28] sm:$0xff]  ;;  %s4012_s5 = scalar_lea.vmem [#allocation7], %s2026_s3  ;;  %s1628_s8 = smul.u32 1536, %s1890_s13 }
  0x5c   : > { %vm240_vm1 = vcmp.eq.s32.totalorder %v2048_v2, 15  ;;  %4259 = vst [vmem:[#allocation15_spill] sm:$0xff] %v2086_v17  ;;  %v397_v22 = vadd.f32 %v2086_v17, %v2055_v4  ;;  %v289_v24 = vsel %vm282_vm2, %v276_v15, %v270_v14  ;;  %4262 = vst [vmem:[#allocation18_spill] sm:$0xff] %v2113_v26  ;;  %v393_v28 = vadd.f32 %v2105_v23, %v2068_v10  ;;  %v2174_v48 = vld [vmem:[%s2030_s17 + $0x38] sm:$0xff]  ;;  %s1512_s16 = sshll.u32 %s4012_s5, 4  ;;  %s1498_s13 = scalar_lea.sflag [#allocation4], %s2023_s30  ;;  %s4076_s16 = int_to_ptr.vmem [resolvable:$true] %s1512_s16 }
  0x5d   : > { %v2099_v21 = vsel %vm240_vm1, %v2086_v17, %v291_v18  ;;  %v2118_v27 = vsel %vm240_vm1, %v2105_v23, %v289_v24  ;;  %v2124_v29 = vsel %vm257_vm0, %v249_v19, %v255_v20  ;;  %v274_v30 = vrot.slane %v2071_v11, 1  ;;  %4267 = vst [vmem:[#allocation23_spill] sm:$0xff] %v2156_v43  ;;  %4270 = vst [vmem:[#allocation26_spill] sm:$0xff] %v2174_v48  ;;  %v2260_v24 = vld [vmem:[%s2030_s17 + $0x58] sm:$0xff]  ;;  %s4074_s25 = scalar_lea.hbm %s4124_s2, %s1628_s8  ;;  %s1773_s26 = scalar_lea.vmem %s4076_s16, 1536 }
  0x5e   : > { %4260 = vst [vmem:[#allocation16_spill] sm:$0xff] %v2099_v21  ;;  %4263 = vst [vmem:[#allocation19_spill] sm:$0xff] %v2124_v29  ;;  %v2128_v31 = vadd.f32 %v397_v22, %v2099_v21  ;;  %v280_v32 = vrot.slane %v2078_v16, 1  ;;  %v401_v33 = vadd.f32 %v2124_v29, %v2078_v16  ;;  %v264_v34 = vsel %vm257_vm0, %v251_v13, %v245_v12  ;;  %p1774_p13 = scmp.ne.s32.totalorder %s4076_s16, %s1773_s26  ;;  %p4492_p1 = scmp.ne.s32.totalorder %s4250_s20, 0 }
  0x5f   : > { %v2136_v35 = vadd.f32 %v393_v28, %v2118_v27  ;;  %v2140_v36 = vsel %vm282_vm2, %v270_v14, %v276_v15  ;;  %v246_v37 = vrot.slane %v2110_v25, 7  ;;  %v252_v38 = vrot.slane %v2113_v26, 7  ;;  %4283 = vst [vmem:[#allocation39_spill] sm:$0xff] %v2260_v24  ;;  %s1851_s24 = smov [#allocation7]  }
  0x60   : > { %4264 = vst [vmem:[#allocation20_spill] sm:$0xff] %v2128_v31  ;;  %4266 = vst [vmem:[#allocation22_spill] sm:$0xff] %v2140_v36  ;;  %625 = vrot.lane.b32.xlu1 %v2128_v31, %s1849_s19  ;;  %v293_v39 = vsel %vm282_vm2, %v280_v32, %v274_v30  ;;  %v2151_v40 = vsel %vm237_vm3, %v2140_v36, %v264_v34  ;;  %v271_v41 = vrot.slane %v2110_v25, 1  ;;  %v277_v42 = vrot.slane %v2113_v26, 1  ;;  %p1775_p12 = pnand %p1774_p13, %p4492_p1  ;;  %s1777_s6 = sshll.u32 %s1851_s24, 4  ;;  %s1778_s6 = int_to_ptr.vmem [resolvable:$false] %s1777_s6 }
  0x61   : > { %4265 = vst [vmem:[#allocation21_spill] sm:$0xff] %v2136_v35  ;;  %621 = vrot.lane.b32.xlu0 %v2136_v35, %s1849_s19  ;;  %v2163_v44 = vsel %vm240_vm1, %v2124_v29, %v293_v39  ;;  %v391_v45 = vadd.f32 %v2151_v40, %v2060_v5  ;;  %v2169_v46 = vsel %vm257_vm0, %v246_v37, %v252_v38  ;;  %v248_v56 = vrot.slane %v2156_v43, 7  ;;  %s1779_s7 = scalar_lea.vmem %s1778_s6, 3072  ;;  %p1780_p5 = scmp.lt.s32.totalorder %s4076_s16, %s1778_s6 }
  0x62   : > { %4268 = vst [vmem:[#allocation24_spill] sm:$0xff] %v2163_v44  ;;  %4269 = vst [vmem:[#allocation25_spill] sm:$0xff] %v2169_v46  ;;  %v268_v47 = vsel %vm257_vm0, %v255_v20, %v249_v19  ;;  %v2177_v49 = vadd.f32 %v401_v33, %v2163_v44  ;;  %v290_v50 = vsel %vm282_vm2, %v277_v42, %v271_v41  ;;  %v254_v59 = vrot.slane %v2174_v48, 7  ;;  %p1776_p10 = pneg %p1775_p12  ;;  %p1781_p7 = scmp.lt.s32.totalorder %s1779_s7, %s1773_s26 }
  0x63   : > { %v394_v51 = vadd.f32 %v2169_v46, %v2113_v26  ;;  %v2185_v52 = vsel %vm282_vm2, %v274_v30, %v280_v32  ;;  %v2188_v53 = vadd.f32 %v391_v45, %v2140_v36  ;;  %v2193_v54 = vsel %vm240_vm1, %v2169_v46, %v290_v50  ;;  %v2448_v46 = vld [vmem:[%s2038_s29 + $0x10] sm:$0xff] }
  0x64   : > { %4271 = vst [vmem:[#allocation27_spill] sm:$0xff] %v2177_v49  ;;  %4272 = vst [vmem:[#allocation28_spill] sm:$0xff] %v2185_v52  ;;  %v2198_v55 = vsel %vm237_vm3, %v2185_v52, %v268_v47  ;;  %629 = vrot.lane.b32.xlu1 %v2177_v49, %s1849_s19  ;;  %v273_v60 = vrot.slane %v2156_v43, 1  ;;  %v279_v61 = vrot.slane %v2174_v48, 1  ;;  %v265_v62 = vsel %vm257_vm0, %v252_v38, %v246_v37  ;;  %p1782_p9 = por %p1781_p7, %p1780_p5 }
  0x65   : > { %4273 = vst [vmem:[#allocation29_spill] sm:$0xff] %v2188_v53  ;;  %4274 = vst [vmem:[#allocation30_spill] sm:$0xff] %v2193_v54  ;;  %v2204_v57 = vadd.f32 %v394_v51, %v2193_v54  ;;  %v399_v58 = vadd.f32 %v2198_v55, %v2071_v11  ;;  %619 = vrot.lane.b32.xlu0 %v2188_v53, %s1849_s19  ;;  %v2217_v63 = vsel %vm282_vm2, %v271_v41, %v277_v42 }
  0x66   : > { %4275 = vst [vmem:[#allocation31_spill] sm:$0xff] %v2198_v55  ;;  %4277 = vst [vmem:[#allocation33_spill] sm:$0xff] %v2217_v63  ;;  %v266_v12 = vsel %vm257_vm0, %v253_v7, %v247_v6  ;;  %v2230_v14 = vsel %vm257_vm0, %v248_v56, %v254_v59  ;;  %v2235_v15 = vsel %vm237_vm3, %v2217_v63, %v265_v62  ;;  %v2246_v6 = vld [vmem:[%s2030_s17 + $0x48] sm:$0xff]  ;;  %v256_v39 = vrot.slane %v2260_v24, 7  ;;  %p1783_p11 = pnand %p1782_p9, %p1776_p10 }
  0x67   : > { %4276 = vst [vmem:[#allocation32_spill] sm:$0xff] %v2204_v57  ;;  %v2226_v13 = vadd.f32 %v399_v58, %v2185_v52  ;;  %4279 = vst [vmem:[#allocation35_spill] sm:$0xff] %v2230_v14  ;;  %v2243_v18 = vsel %vm282_vm2, %v272_v8, %v278_v9  ;;  %v292_v7 = vsel %vm282_vm2, %v279_v61, %v273_v60  ;;  %v250_v37 = vrot.slane %v2246_v6, 7 }
  0x68   : > { %4280 = vst [vmem:[#allocation36_spill] sm:$0xff] %v2235_v15  ;;  %4281 = vst [vmem:[#allocation37_spill] sm:$0xff] %v2243_v18  ;;  %v398_v19 = vadd.f32 %v2230_v14, %v2174_v48  ;;  %v392_v20 = vadd.f32 %v2235_v15, %v2110_v25  ;;  %v2257_v22 = vsel %vm237_vm3, %v2243_v18, %v266_v12  ;;  %633 = vrot.lane.b32.xlu1 %v2204_v57, %s1849_s19  ;;  %v2429_v25 = vld [vmem:[%s2038_s29] sm:$0xff] }
  0x69   : > { %4278 = vst [vmem:[#allocation34_spill] sm:$0xff] %v2226_v13  ;;  %4282 = vst [vmem:[#allocation38_spill] sm:$0xff] %v2246_v6  ;;  %v2267_v8 = vsel %vm240_vm1, %v2230_v14, %v292_v7  ;;  %v395_v9 = vadd.f32 %v2257_v22, %v2052_v3  ;;  %v267_v28 = vsel %vm257_vm0, %v254_v59, %v248_v56  ;;  %627 = vrot.lane.b32.xlu0 %v2226_v13, %s1849_s19  ;;  %v2412_v14 = vld [vmem:[%s2038_s29 + $0x28] sm:$0xff] }
  0x6a   : > { %4284 = vst [vmem:[#allocation40_spill] sm:$0xff] %v2267_v8  ;;  %v2275_v30 = vsel %vm282_vm2, %v273_v60, %v279_v61  ;;  %v2280_v32 = vadd.f32 %v398_v19, %v2267_v8  ;;  %v2283_v33 = vadd.f32 %v392_v20, %v2217_v63  ;;  %v275_v41 = vrot.slane %v2246_v6, 1  ;;  %v2321_v60 = vld [vmem:[%s2038_s29 + $0x20] sm:$0xff]  ;;  %v2324_v61 = vld [vmem:[%s2038_s29 + $0x30] sm:$0xff] }
  0x6b   : > { %4285 = vst [vmem:[#allocation41_spill] sm:$0xff] %v2275_v30  ;;  %v2288_v34 = vsel %vm237_vm3, %v2275_v30, %v267_v28  ;;  %v281_v42 = vrot.slane %v2260_v24, 1  ;;  %v2299_v45 = vadd.f32 %v395_v9, %v2243_v18  ;;  %v2303_v47 = vsel %vm257_vm0, %v250_v37, %v256_v39  ;;  %v2339_v19 = vld [vmem:[%s2038_s29 + $0x40] sm:$0xff] }
  0x6c   : > { %4286 = vst [vmem:[#allocation42_spill] sm:$0xff] %v2280_v32  ;;  %4287 = vst [vmem:[#allocation43_spill] sm:$0xff] %v2283_v33  ;;  %v396_v38 = vadd.f32 %v2288_v34, %v2156_v43  ;;  %637 = vrot.lane.b32.xlu1 %v2280_v32, %s1849_s19  ;;  %v269_v50 = vsel %vm257_vm0, %v256_v39, %v250_v37  ;;  %v402_v58 = vadd.f32 %v2303_v47, %v2260_v24  ;;  %v2349_v37 = vld [vmem:[%s2038_s29 + $0x50] sm:$0xff] }
  0x6d   : > { %4288 = vst [vmem:[#allocation44_spill] sm:$0xff] %v2288_v34  ;;  %4289 = vst [vmem:[#allocation45_spill] sm:$0xff] %v2299_v45  ;;  %631 = vrot.lane.b32.xlu0 %v2283_v33, %s1849_s19  ;;  %v294_v56 = vsel %vm282_vm2, %v281_v42, %v275_v41  ;;  %v2318_v59 = vsel %vm282_vm2, %v275_v41, %v281_v42  ;;  %v321_v9 = vrot.slane %v2321_v60, 7  ;;  %v327_v28 = vrot.slane %v2324_v61, 7 }
  0x6e   : > { %4290 = vst [vmem:[#allocation46_spill] sm:$0xff] %v2303_v47  ;;  %v2310_v51 = vadd.f32 %v396_v38, %v2275_v30  ;;  %4292 = vst [vmem:[#allocation48_spill] sm:$0xff] %v2318_v59  ;;  %v2329_v62 = vsel %vm240_vm1, %v2303_v47, %v294_v56  ;;  %v2334_v12 = vsel %vm237_vm3, %v2318_v59, %v269_v50  ;;  %v345_v39 = vrot.slane %v2321_v60, 1 }
  0x6f   : > { %4293 = vst [vmem:[#allocation49_spill] sm:$0xff] %v2329_v62  ;;  %4294 = vst [vmem:[#allocation50_spill] sm:$0xff] %v2334_v12  ;;  %v400_v7 = vadd.f32 %v2334_v12, %v2246_v6  ;;  %v2344_v20 = vadd.f32 %v402_v58, %v2329_v62  ;;  %v351_v41 = vrot.slane %v2324_v61, 1  ;;  %v2360_v42 = vsel %vm257_vm0, %v321_v9, %v327_v28 }
  0x70   : > { %4291 = vst [vmem:[#allocation47_spill] sm:$0xff] %v2310_v51  ;;  %623 = vrot.lane.b32.xlu1 %v2299_v45, %s1849_s19  ;;  %v339_v50 = vsel %vm257_vm0, %v327_v28, %v321_v9  ;;  %v323_v56 = vrot.slane %v2339_v19, 7  ;;  %v329_v0 = vrot.slane %v2349_v37, 7  ;;  %v353_v47 = vrot.slane %v2349_v37, 1 }
  0x71   : > { %4295 = vst [vmem:[#allocation51_spill] sm:$0xff] %v2344_v20  ;;  %635 = vrot.lane.b32.xlu0 %v2310_v51, %s1849_s19  ;;  %v2354_v38 = vadd.f32 %v400_v7, %v2318_v59  ;;  %v363_v58 = vsel %vm282_vm2, %v351_v41, %v345_v39  ;;  %v2369_v7 = vsel %vm282_vm2, %v345_v39, %v351_v41  ;;  %v2373_v59 = vld [vmem:[%s2038_s29 + $0x8] sm:$0xff]  ;;  %v347_v39 = vrot.slane %v2339_v19, 1  ;;  %v2389_v41 = vld [vmem:[%s2038_s29 + $0x18] sm:$0xff] }
  0x72   : > { %v2380_v9 = vsel %vm240_vm1, %v2360_v42, %v363_v58  ;;  %v2385_v28 = vsel %vm237_vm3, %v2369_v7, %v339_v50  ;;  %v2403_v50 = vsel %vm257_vm0, %v323_v56, %v329_v0  ;;  %v341_v24 = vsel %vm257_vm0, %v329_v0, %v323_v56  ;;  %v2424_v56 = vld [vmem:[%s2038_s29 + $0x38] sm:$0xff] }
  0x73   : > { %4296 = vst [vmem:[#allocation52_spill] sm:$0xff] %v2354_v38  ;;  %v2395_v6 = vmul.f32 %v2380_v9, %v2099_v21  ;;  %v2399_v58 = vmul.f32 %v2385_v28, %v2257_v22  ;;  %v320_v30 = vrot.slane %v2373_v59, 7  ;;  %v326_v21 = vrot.slane %v2389_v41, 7 }
  0x74   : > { %641 = vrot.lane.b32.xlu1 %v2344_v20, %s1849_s19  ;;  %v344_v43 = vrot.slane %v2373_v59, 1  ;;  %v365_v48 = vsel %vm282_vm2, %v353_v47, %v347_v39  ;;  %v2420_v63 = vsel %vm282_vm2, %v347_v39, %v353_v47  ;;  %v350_v0 = vrot.slane %v2389_v41, 1 }
  0x75   : > { %639 = vrot.lane.b32.xlu0 %v2354_v38, %s1849_s19  ;;  %4297 = vst [vmem:[#allocation53_spill] sm:$0xff] %v2395_v6  ;;  %4298 = vst [vmem:[#allocation54_spill] sm:$0xff] %v2399_v58  ;;  %v2439_v47 = vsel %vm237_vm3, %v2420_v63, %v341_v24  ;;  %v2443_v39 = vsel %vm257_vm0, %v320_v30, %v326_v21  ;;  %v322_v24 = vrot.slane %v2412_v14, 7  ;;  %v352_v29 = vrot.slane %v2424_v56, 1 }
  0x76   : > { %v362_v6 = vsel %vm282_vm2, %v350_v0, %v344_v43  ;;  %v2463_v52 = vsel %vm282_vm2, %v344_v43, %v350_v0  ;;  %v346_v43 = vrot.slane %v2412_v14, 1  ;;  %v2484_v0 = vld [vmem:[%s2038_s29 + $0x58] sm:$0xff]  ;;  %v349_v16 = vrot.slane %v2448_v46, 1 }
  0x78   : > { %658 = vrot.lane.b32.xlu1 %v2136_v35, %s1850_s4  ;;  %v2434_v35 = vsel %vm240_vm1, %v2403_v50, %v365_v48  ;;  %v2456_v48 = vmul.f32 %v2439_v47, %v2198_v55  ;;  %v2475_v55 = vsel %vm240_vm1, %v2443_v39, %v362_v6 }
  0x79   : > { %656 = vrot.lane.b32.xlu0 %v2188_v53, %s1850_s4  ;;  %v338_v53 = vsel %vm257_vm0, %v326_v21, %v320_v30  ;;  %v2452_v26 = vmul.f32 %v2434_v35, %v2163_v44  ;;  %v328_v21 = vrot.slane %v2424_v56, 7  ;;  %v2467_v30 = vld [vmem:[%s2038_s29 + $0x48] sm:$0xff]  ;;  %v319_v44 = vrot.slane %v2429_v25, 7 }
  0x7a   : > { %4300 = vst [vmem:[#allocation56_spill] sm:$0xff] %v2456_v48  ;;  %v343_v48 = vrot.slane %v2429_v25, 1  ;;  %v2492_v6 = vmul.f32 %v2475_v55, %v2193_v54  ;;  %v324_v58 = vrot.slane %v2467_v30, 7 }
  0x7b   : > { %4299 = vst [vmem:[#allocation55_spill] sm:$0xff] %v2452_v26  ;;  %v2480_v26 = vsel %vm237_vm3, %v2463_v52, %v338_v53  ;;  %v2500_v53 = vsel %vm257_vm0, %v322_v24, %v328_v21 }
  0x7c   : > { %662 = vrot.lane.b32.xlu1 %v2128_v31, %s1850_s4  ;;  %v325_v31 = vrot.slane %v2448_v46, 7  ;;  %4301 = vst [vmem:[#allocation57_spill] sm:$0xff] %v2492_v6  ;;  %v2496_v11 = vmul.f32 %v2480_v26, %v2235_v15  ;;  %v422_v54 = vadd.f32 %v2500_v53, %v2424_v56  ;;  %v330_v6 = vrot.slane %v2484_v0, 7 }
  0x7d   : > { %660 = vrot.lane.b32.xlu0 %v2299_v45, %s1850_s4  ;;  %v340_v45 = vsel %vm257_vm0, %v328_v21, %v322_v24  ;;  %v348_v15 = vrot.slane %v2467_v30, 1  ;;  %v2517_v24 = vsel %vm282_vm2, %v346_v43, %v352_v29  ;;  %v354_v21 = vrot.slane %v2484_v0, 1 }
  0x7e   : > { %4302 = vst [vmem:[#allocation58_spill] sm:$0xff] %v2496_v11  ;;  %v364_v11 = vsel %vm282_vm2, %v352_v29, %v346_v43  ;;  %v2534_v4 = vsel %vm257_vm0, %v324_v58, %v330_v6  ;;  %v342_v29 = vsel %vm257_vm0, %v330_v6, %v324_v58  ;;  %v337_v43 = vsel %vm257_vm0, %v325_v31, %v319_v44 }
  0x7f   : > { %v2525_v17 = vsel %vm240_vm1, %v2500_v53, %v364_v11  ;;  %v2553_v36 = vsel %vm282_vm2, %v343_v48, %v349_v16  ;;  %v366_v58 = vsel %vm282_vm2, %v354_v21, %v348_v15  ;;  %v426_v6 = vadd.f32 %v2534_v4, %v2484_v0 }
  0x80   : > { %666 = vrot.lane.b32.xlu1 %v2177_v49, %s1850_s4  ;;  %v2530_v49 = vsel %vm237_vm3, %v2517_v24, %v340_v45  ;;  %v2545_v11 = vmul.f32 %v2525_v17, %v2267_v8  ;;  %v2567_v8 = vsel %vm257_vm0, %v319_v44, %v325_v31 }
  0x81   : > { %664 = vrot.lane.b32.xlu0 %v2226_v13, %s1850_s4  ;;  %v2541_v13 = vadd.f32 %v422_v54, %v2525_v17  ;;  %v2549_v45 = vmul.f32 %v2530_v49, %v2288_v34  ;;  %v2561_v54 = vsel %vm282_vm2, %v348_v15, %v354_v21  ;;  %v2572_v34 = vsel %vm240_vm1, %v2534_v4, %v366_v58 }
  0x82   : > { %4303 = vst [vmem:[#allocation59_spill] sm:$0xff] %v2545_v11  ;;  %v2577_v11 = vsel %vm237_vm3, %v2561_v54, %v342_v29  ;;  %v2582_v15 = vadd.f32 %v426_v6, %v2572_v34  ;;  %v2586_v31 = vmul.f32 %v2572_v34, %v2329_v62  ;;  %v361_v29 = vsel %vm282_vm2, %v349_v16, %v343_v48 }
  0x83   : > { %4304 = vst [vmem:[#allocation60_spill] sm:$0xff] %v2549_v45  ;;  %v424_v44 = vadd.f32 %v2577_v11, %v2467_v30  ;;  %v2592_v21 = vmul.f32 %v2577_v11, %v2334_v12  ;;  %v2599_v58 = vsel %vm237_vm3, %v2553_v36, %v337_v43  ;;  %v455_v16 = vmul.f32 %v2257_v22, %v2257_v22 }
  0x84   : > { %670 = vrot.lane.b32.xlu1 %v2204_v57, %s1850_s4  ;;  %4305 = vst [vmem:[#allocation61_spill] sm:$0xff] %v2582_v15  ;;  %4306 = vst [vmem:[#allocation62_spill] sm:$0xff] %v2586_v31  ;;  %v443_v57 = vmul.f32 %v2052_v3, %v2052_v3  ;;  %v2617_v1 = vsel %vm240_vm1, %v2567_v8, %v361_v29  ;;  %v415_v48 = vadd.f32 %v2599_v58, %v2429_v25 }
  0x85   : > { %668 = vrot.lane.b32.xlu0 %v2283_v33, %s1850_s4  ;;  %4307 = vst [vmem:[#allocation63_spill] sm:$0xff] %v2592_v21  ;;  %v2602_v6 = vadd.f32 %v424_v44, %v2561_v54  ;;  %v417_v33 = vadd.f32 %v2567_v8, %v2448_v46  ;;  %v479_v43 = vmul.f32 %v2243_v18, %v2243_v18 }
  0x86   : > { %v467_v44 = vadd.f32 %v455_v16, %v443_v57  ;;  %v2635_v2 = vadd.f32 %v415_v48, %v2553_v36  ;;  %v419_v57 = vadd.f32 %v2385_v28, %v2321_v60  ;;  %v425_v29 = vadd.f32 %v2403_v50, %v2349_v37 }
  0x87   : > { %4308 = vst [vmem:[#allocation64_spill] sm:$0xff] %v2602_v6  ;;  %v2626_v22 = vadd.f32 %v417_v33, %v2617_v1  ;;  %v423_v16 = vadd.f32 %v2439_v47, %v2339_v19  ;;  %v513_v62 = vmul.f32 %v2567_v8, %v2567_v8  ;;  %v539_v18 = vmul.f32 %v2369_v7, %v2369_v7 }
  0x88   : > { %674 = vrot.lane.b32.xlu1 %v2280_v32, %s1850_s4  ;;  %v2630_v32 = vadd.f32 %v479_v43, %v467_v44  ;;  %4311 = vst [vmem:[#allocation67_spill] sm:$0xff] %v2635_v2  ;;  %v418_v43 = vadd.f32 %v2443_v39, %v2389_v41  ;;  %v2653_v48 = vadd.f32 %v419_v57, %v2369_v7 }
  0x89   : > { %672 = vrot.lane.b32.xlu0 %v2310_v51, %s1850_s4  ;;  %4309 = vst [vmem:[#allocation65_spill] sm:$0xff] %v2626_v22  ;;  %v421_v51 = vadd.f32 %v2360_v42, %v2324_v61  ;;  %v416_v44 = vadd.f32 %v2480_v26, %v2373_v59  ;;  %v2669_v57 = vadd.f32 %v423_v16, %v2420_v63 }
  0x8a   : > { %4310 = vst [vmem:[#allocation66_spill] sm:$0xff] %v2630_v32  ;;  %4313 = vst [vmem:[#allocation69_spill] sm:$0xff] %v2653_v48  ;;  %v2672_v12 = vadd.f32 %v418_v43, %v2475_v55  ;;  %v537_v32 = vmul.f32 %v2617_v1, %v2617_v1  ;;  %v511_v16 = vmul.f32 %v2599_v58, %v2599_v58 }
  0x8b   : > { %v2644_v33 = vadd.f32 %v421_v51, %v2380_v9  ;;  %v2660_v51 = vadd.f32 %v425_v29, %v2434_v35  ;;  %4315 = vst [vmem:[#allocation71_spill] sm:$0xff] %v2669_v57  ;;  %v499_v29 = vmul.f32 %v2429_v25, %v2429_v25  ;;  %v2681_v31 = vadd.f32 %v416_v44, %v2463_v52 }
  0x8c   : > { %678 = vrot.lane.b32.xlu1 %v2344_v20, %s1850_s4  ;;  %v501_v20 = vmul.f32 %v2448_v46, %v2448_v46  ;;  %v535_v43 = vmul.f32 %v2553_v36, %v2553_v36  ;;  %v541_v44 = vmul.f32 %v2380_v9, %v2380_v9  ;;  %v509_v3 = vmul.f32 %v2349_v37, %v2349_v37 }
  0x8d   : > { %676 = vrot.lane.b32.xlu0 %v2354_v38, %s1850_s4  ;;  %4312 = vst [vmem:[#allocation68_spill] sm:$0xff] %v2644_v33  ;;  %v420_v38 = vadd.f32 %v2530_v49, %v2412_v14  ;;  %4314 = vst [vmem:[#allocation70_spill] sm:$0xff] %v2660_v51 }
  0x8e   : > { %v525_v21 = vadd.f32 %v513_v62, %v501_v20  ;;  %v523_v62 = vadd.f32 %v511_v16, %v499_v29  ;;  %v503_v20 = vmul.f32 %v2321_v60, %v2321_v60  ;;  %v519_v16 = vmul.f32 %v2439_v47, %v2439_v47 }
  0x8f   : > { %v2688_v45 = vadd.f32 %v420_v38, %v2517_v24 }
  0x90   : > { %743 = vrot.lane.b32.xlu1 %v2626_v22, %s1849_s19  ;;  %v515_v22 = vmul.f32 %v2385_v28, %v2385_v28  ;;  %v2712_v9 = vadd.f32 %v535_v43, %v523_v62  ;;  %v545_v28 = vmul.f32 %v2434_v35, %v2434_v35  ;;  %v514_v35 = vmul.f32 %v2443_v39, %v2443_v39 }
  0x91   : > { %741 = vrot.lane.b32.xlu0 %v2635_v2, %s1849_s19  ;;  %4316 = vst [vmem:[#allocation72_spill] sm:$0xff] %v2688_v45  ;;  %v517_v2 = vmul.f32 %v2360_v42, %v2360_v42  ;;  %v538_v43 = vmul.f32 %v2475_v55, %v2475_v55  ;;  %v506_v55 = vmul.f32 %v2424_v56, %v2424_v56 }
  0x92   : > { %4318 = vst [vmem:[#allocation74_spill] sm:$0xff] %v2712_v9 }
  0x94   : > { %747 = vrot.lane.b32.xlu1 %v2644_v33, %s1849_s19  ;;  %v505_v33 = vmul.f32 %v2324_v61, %v2324_v61 }
  0x95   : > { %745 = vrot.lane.b32.xlu0 %v2653_v48, %s1849_s19  ;;  %v2696_v48 = vadd.f32 %v537_v32, %v525_v21  ;;  %v521_v32 = vmul.f32 %v2403_v50, %v2403_v50  ;;  %v527_v21 = vadd.f32 %v515_v22, %v503_v20  ;;  %v502_v22 = vmul.f32 %v2389_v41, %v2389_v41 }
  0x96   : > { %v529_v38 = vadd.f32 %v517_v2, %v505_v33  ;;  %v507_v2 = vmul.f32 %v2339_v19, %v2339_v19  ;;  %v536_v20 = vmul.f32 %v2463_v52, %v2463_v52 }
  0x97   : > { %4317 = vst [vmem:[#allocation73_spill] sm:$0xff] %v2696_v48  ;;  %v533_v29 = vadd.f32 %v521_v32, %v509_v3  ;;  %v543_v48 = vmul.f32 %v2420_v63, %v2420_v63  ;;  %v526_v62 = vadd.f32 %v514_v35, %v502_v22  ;;  %v540_v22 = vmul.f32 %v2517_v24, %v2517_v24 }
  0x98   : > { %751 = vrot.lane.b32.xlu1 %v2660_v51, %s1849_s19  ;;  %v2718_v33 = vadd.f32 %v541_v44, %v529_v38  ;;  %v2724_v51 = vadd.f32 %v539_v18, %v527_v21  ;;  %v531_v47 = vadd.f32 %v519_v16, %v507_v2  ;;  %v500_v44 = vmul.f32 %v2373_v59, %v2373_v59 }
  0x99   : > { %749 = vrot.lane.b32.xlu0 %v2669_v57, %s1849_s19  ;;  %v2734_v3 = vadd.f32 %v545_v28, %v533_v29  ;;  %v512_v18 = vmul.f32 %v2480_v26, %v2480_v26  ;;  %v518_v38 = vmul.f32 %v2500_v53, %v2500_v53  ;;  %v542_v28 = vmul.f32 %v2525_v17, %v2525_v17 }
  0x9a   : > { %4319 = vst [vmem:[#allocation75_spill] sm:$0xff] %v2718_v33  ;;  %4320 = vst [vmem:[#allocation76_spill] sm:$0xff] %v2724_v51  ;;  %v2748_v32 = vadd.f32 %v543_v48, %v531_v47  ;;  %v504_v26 = vmul.f32 %v2412_v14, %v2412_v14  ;;  %v2754_v2 = vadd.f32 %v538_v43, %v526_v62 }
  0x9b   : > { %4321 = vst [vmem:[#allocation77_spill] sm:$0xff] %v2734_v3  ;;  %v524_v21 = vadd.f32 %v512_v18, %v500_v44  ;;  %v530_v29 = vadd.f32 %v518_v38, %v506_v55  ;;  %v516_v16 = vmul.f32 %v2530_v49, %v2530_v49  ;;  %v510_v17 = vmul.f32 %v2484_v0, %v2484_v0 }
  0x9c   : > { %755 = vrot.lane.b32.xlu1 %v2672_v12, %s1849_s19  ;;  %4322 = vst [vmem:[#allocation78_spill] sm:$0xff] %v2748_v32  ;;  %4323 = vst [vmem:[#allocation79_spill] sm:$0xff] %v2754_v2  ;;  %v522_v35 = vmul.f32 %v2534_v4, %v2534_v4  ;;  %v546_v43 = vmul.f32 %v2572_v34, %v2572_v34  ;;  %v508_v44 = vmul.f32 %v2467_v30, %v2467_v30 }
  0x9d   : > { %753 = vrot.lane.b32.xlu0 %v2681_v31, %s1849_s19  ;;  %v2762_v48 = vadd.f32 %v536_v20, %v524_v21  ;;  %v2772_v49 = vadd.f32 %v542_v28, %v530_v29  ;;  %v528_v47 = vadd.f32 %v516_v16, %v504_v26  ;;  %v520_v18 = vmul.f32 %v2577_v11, %v2577_v11  ;;  %v4328_v16 = vld [vmem:[#allocation22_spill] sm:$0xff] }
  0x9e   : > { %v534_v62 = vadd.f32 %v522_v35, %v510_v17  ;;  %v544_v20 = vmul.f32 %v2561_v54, %v2561_v54  ;;  %v561_v55 = vmul.f32 %v2448_v46, %v2068_v10  ;;  %v573_v34 = vmul.f32 %v2567_v8, %v2105_v23  ;;  %v4331_v17 = vld [vmem:[#allocation15_spill] sm:$0xff] }
  0x9f   : > { %4324 = vst [vmem:[#allocation80_spill] sm:$0xff] %v2762_v48  ;;  %4325 = vst [vmem:[#allocation81_spill] sm:$0xff] %v2772_v49  ;;  %v2784_v38 = vadd.f32 %v540_v22, %v528_v47  ;;  %v532_v21 = vadd.f32 %v520_v18, %v508_v44  ;;  %v597_v28 = vmul.f32 %v2617_v1, %v2118_v27  ;;  %v4330_v1 = vld [vmem:[#allocation12_spill] sm:$0xff]  ;;  %v4334_v18 = vld [vmem:[#allocation37_spill] sm:$0xff] }
  0xa0   : > { %759 = vrot.lane.b32.xlu1 %v2541_v13, %s1849_s19  ;;  %v559_v26 = vmul.f32 %v2429_v25, %v2060_v5  ;;  %v2792_v11 = vadd.f32 %v546_v43, %v534_v62  ;;  %v585_v29 = vadd.f32 %v573_v34, %v561_v55  ;;  %v571_v46 = vmul.f32 %v2599_v58, %v2151_v40  ;;  %v4332_v43 = vld [vmem:[#allocation11_spill] sm:$0xff]  ;;  %v4335_v62 = vld [vmem:[#allocation14_spill] sm:$0xff] }
  0xa1   : > { %757 = vrot.lane.b32.xlu0 %v2688_v45, %s1849_s19  ;;  %4326 = vst [vmem:[#allocation82_spill] sm:$0xff] %v2784_v38  ;;  %v595_v8 = vmul.f32 %v2553_v36, %v4328_v16  ;;  %v2800_v22 = vadd.f32 %v544_v20, %v532_v21  ;;  %v565_v25 = vmul.f32 %v2324_v61, %v4330_v1  ;;  %v4336_v34 = vld [vmem:[#allocation54_spill] sm:$0xff] }
  0xa2   : > { %4327 = vst [vmem:[#allocation83_spill] sm:$0xff] %v2792_v11  ;;  %v577_v35 = vmul.f32 %v2360_v42, %v4331_v17  ;;  %v563_v47 = vmul.f32 %v2321_v60, %v4332_v43  ;;  %v2808_v44 = vadd.f32 %v597_v28, %v585_v29  ;;  %v583_v58 = vadd.f32 %v571_v46, %v559_v26  ;;  %v4338_v11 = vld [vmem:[#allocation13_spill] sm:$0xff]  ;;  %v4341_v26 = vld [vmem:[#allocation28_spill] sm:$0xff]  ;;  %v4342_v29 = vld [vmem:[#allocation67_spill] sm:$0xff] }
  0xa3   : > { %4329 = vst [vmem:[#allocation22_spill] sm:$0xff] %v2800_v22  ;;  %v599_v36 = vmul.f32 %v2369_v7, %v4334_v18  ;;  %v569_v55 = vmul.f32 %v2349_v37, %v4335_v62  ;;  %v4337_v22 = vld [vmem:[#allocation19_spill] sm:$0xff]  ;;  %v567_v42 = vmul.f32 %v2339_v19, %v4338_v11  ;;  %v4339_v60 = vld [vmem:[#allocation65_spill] sm:$0xff]  ;;  %v603_v7 = vmul.f32 %v2420_v63, %v4341_v26 }
  0xa4   : > { %763 = vrot.lane.b32.xlu1 %v2582_v15, %s1849_s19  ;;  %4333 = vst [vmem:[#allocation12_spill] sm:$0xff] %v2808_v44  ;;  %v589_v20 = vadd.f32 %v577_v35, %v565_v25  ;;  %v587_v21 = vadd.f32 %v4336_v34, %v563_v47  ;;  %v581_v61 = vmul.f32 %v2403_v50, %v4337_v22  ;;  %v4343_v37 = vld [vmem:[#allocation53_spill] sm:$0xff]  ;;  %v4346_v35 = vld [vmem:[#allocation56_spill] sm:$0xff]  ;;  %v4347_v19 = vld [vmem:[#allocation55_spill] sm:$0xff] }
  0xa5   : > { %761 = vrot.lane.b32.xlu0 %v2602_v6, %s1849_s19  ;;  %v2821_v28 = vadd.f32 %v595_v8, %v583_v58  ;;  %v591_v43 = vadd.f32 %v4346_v35, %v567_v42  ;;  %v4350_v8 = vld [vmem:[#allocation68_spill] sm:$0xff]  ;;  %v4351_v63 = vld [vmem:[#allocation69_spill] sm:$0xff]  ;;  %v4352_v58 = vld [vmem:[#allocation70_spill] sm:$0xff]  ;;  %v441_v42 = vmul.f32 %v2068_v10, %v2068_v10  ;;  %v451_v10 = vmul.f32 %v2151_v40, %v2151_v40 }
  0xa6   : > { %v2828_v46 = vadd.f32 %v4343_v37, %v589_v20  ;;  %v2830_v25 = vadd.f32 %v599_v36, %v587_v21  ;;  %v593_v50 = vadd.f32 %v581_v61, %v569_v55  ;;  %v4353_v36 = vld [vmem:[#allocation18_spill] sm:$0xff]  ;;  %v4354_v20 = vld [vmem:[#allocation25_spill] sm:$0xff]  ;;  %v475_v40 = vmul.f32 %v4328_v16, %v4328_v16 }
  0xa7   : > { %4340 = vst [vmem:[#allocation15_spill] sm:$0xff] %v2821_v28  ;;  %v2836_v18 = vadd.f32 %v603_v7, %v591_v43  ;;  %v562_v55 = vmul.f32 %v2389_v41, %v4353_v36  ;;  %v574_v34 = vmul.f32 %v2443_v39, %v4354_v20  ;;  %v4355_v21 = vld [vmem:[#allocation17_spill] sm:$0xff]  ;;  %v453_v7 = vmul.f32 %v2105_v23, %v2105_v23 }
  0xa8   : > { %779 = vrot.lane.b32.xlu1 %v4339_v60, %s1850_s4  ;;  %4344 = vst [vmem:[#allocation11_spill] sm:$0xff] %v2828_v46  ;;  %4345 = vst [vmem:[#allocation37_spill] sm:$0xff] %v2830_v25  ;;  %v2834_v47 = vadd.f32 %v4347_v19, %v593_v50  ;;  %v560_v61 = vmul.f32 %v2373_v59, %v4355_v21  ;;  %v4356_v50 = vld [vmem:[#allocation58_spill] sm:$0xff]  ;;  %v4357_v43 = vld [vmem:[#allocation33_spill] sm:$0xff]  ;;  %v439_v59 = vmul.f32 %v2060_v5, %v2060_v5 }
  0xa9   : > { %777 = vrot.lane.b32.xlu0 %v4342_v29, %s1850_s4  ;;  %4349 = vst [vmem:[#allocation54_spill] sm:$0xff] %v2836_v18  ;;  %v586_v37 = vadd.f32 %v574_v34, %v562_v55  ;;  %v596_v19 = vmul.f32 %v2463_v52, %v4357_v43  ;;  %v4358_v41 = vld [vmem:[#allocation57_spill] sm:$0xff]  ;;  %v465_v55 = vadd.f32 %v453_v7, %v441_v42  ;;  %v4361_v42 = vld [vmem:[#allocation26_spill] sm:$0xff] }
  0xaa   : > { %4348 = vst [vmem:[#allocation14_spill] sm:$0xff] %v2834_v47  ;;  %v584_v35 = vadd.f32 %v4356_v50, %v560_v61  ;;  %v477_v52 = vmul.f32 %v2118_v27, %v2118_v27  ;;  %v445_v34 = vmul.f32 %v4330_v1, %v4330_v1  ;;  %v457_v61 = vmul.f32 %v4331_v17, %v4331_v17  ;;  %v4362_v27 = vld [vmem:[#allocation35_spill] sm:$0xff] }
  0xab   : > { %v2868_v23 = vadd.f32 %v4358_v41, %v586_v37  ;;  %v463_v5 = vadd.f32 %v451_v10, %v439_v59  ;;  %v566_v7 = vmul.f32 %v2424_v56, %v4361_v42  ;;  %v578_v37 = vmul.f32 %v2500_v53, %v4362_v27  ;;  %v4363_v1 = vld [vmem:[#allocation23_spill] sm:$0xff]  ;;  %v4366_v53 = vld [vmem:[#allocation60_spill] sm:$0xff] }
  0xac   : > { %783 = vrot.lane.b32.xlu1 %v4350_v8, %s1850_s4  ;;  %v2870_v39 = vadd.f32 %v596_v19, %v584_v35  ;;  %v564_v50 = vmul.f32 %v2412_v14, %v4363_v1  ;;  %v2890_v17 = vadd.f32 %v477_v52, %v465_v55  ;;  %v469_v35 = vadd.f32 %v457_v61, %v445_v34  ;;  %v4365_v19 = vld [vmem:[#allocation16_spill] sm:$0xff]  ;;  %v4370_v61 = vld [vmem:[#allocation31_spill] sm:$0xff] }
  0xad   : > { %781 = vrot.lane.b32.xlu0 %v4351_v63, %s1850_s4  ;;  %4359 = vst [vmem:[#allocation19_spill] sm:$0xff] %v2868_v23  ;;  %v481_v41 = vmul.f32 %v4365_v19, %v4365_v19  ;;  %v449_v59 = vmul.f32 %v4335_v62, %v4335_v62  ;;  %v461_v56 = vmul.f32 %v4337_v22, %v4337_v22  ;;  %v4369_v52 = vld [vmem:[#allocation24_spill] sm:$0xff] }
  0xae   : > { %4360 = vst [vmem:[#allocation13_spill] sm:$0xff] %v2870_v39  ;;  %4364 = vst [vmem:[#allocation65_spill] sm:$0xff] %v2890_v17  ;;  %v590_v16 = vadd.f32 %v578_v37, %v566_v7  ;;  %v588_v10 = vadd.f32 %v4366_v53, %v564_v50  ;;  %v2905_v55 = vadd.f32 %v475_v40, %v463_v5  ;;  %v4371_v7 = vld [vmem:[#allocation59_spill] sm:$0xff]  ;;  %v4375_v53 = vld [vmem:[#allocation46_spill] sm:$0xff] }
  0xaf   : > { %v485_v62 = vmul.f32 %v4369_v52, %v4369_v52  ;;  %v447_v34 = vmul.f32 %v4338_v11, %v4338_v11  ;;  %v459_v22 = vmul.f32 %v4370_v61, %v4370_v61  ;;  %v582_v5 = vmul.f32 %v2534_v4, %v4375_v53  ;;  %v4377_v61 = vld [vmem:[#allocation38_spill] sm:$0xff]  ;;  %v4378_v4 = vld [vmem:[#allocation48_spill] sm:$0xff] }
  0xb0   : > { %787 = vrot.lane.b32.xlu1 %v4352_v58, %s1850_s4  ;;  %4368 = vst [vmem:[#allocation28_spill] sm:$0xff] %v2905_v55  ;;  %v2914_v37 = vadd.f32 %v4371_v7, %v590_v16  ;;  %v2922_v40 = vadd.f32 %v481_v41, %v469_v35  ;;  %v442_v52 = vmul.f32 %v4353_v36, %v4353_v36  ;;  %v4379_v41 = vld [vmem:[#allocation36_spill] sm:$0xff]  ;;  %v4380_v7 = vld [vmem:[#allocation63_spill] sm:$0xff] }
  0xb1   : > { %785 = vrot.lane.b32.xlu0 %v2669_v57, %s1850_s4  ;;  %v4367_v57 = vld [vmem:[#allocation41_spill] sm:$0xff]  ;;  %v454_v11 = vmul.f32 %v4354_v20, %v4354_v20  ;;  %v568_v16 = vmul.f32 %v2467_v30, %v4377_v61  ;;  %v604_v35 = vmul.f32 %v2561_v54, %v4378_v4  ;;  %v471_v36 = vadd.f32 %v459_v22, %v447_v34  ;;  %v4401_v63 = vld [vmem:[#allocation52_spill] sm:$0xff] }
  0xb2   : > { %v600_v14 = vmul.f32 %v2517_v24, %v4367_v57  ;;  %4372 = vst [vmem:[#allocation67_spill] sm:$0xff] %v2914_v37  ;;  %v4374_v24 = vld [vmem:[#allocation39_spill] sm:$0xff]  ;;  %4376 = vst [vmem:[#allocation56_spill] sm:$0xff] %v2922_v40  ;;  %v440_v20 = vmul.f32 %v4355_v21, %v4355_v21  ;;  %v452_v30 = vmul.f32 %v4379_v41, %v4379_v41 }
  0xb3   : > { %v570_v19 = vmul.f32 %v2484_v0, %v4374_v24  ;;  %v483_v0 = vmul.f32 %v4341_v26, %v4341_v26  ;;  %v466_v26 = vadd.f32 %v454_v11, %v442_v52  ;;  %v476_v21 = vmul.f32 %v4357_v43, %v4357_v43  ;;  %v4386_v52 = vld [vmem:[#allocation66_spill] sm:$0xff]  ;;  %v4390_v43 = vld [vmem:[#allocation40_spill] sm:$0xff] }
  0xb4   : > { %791 = vrot.lane.b32.xlu1 %v2672_v12, %s1850_s4  ;;  %v2916_v50 = vadd.f32 %v600_v14, %v588_v10  ;;  %v473_v10 = vadd.f32 %v461_v56, %v449_v59  ;;  %v4381_v59 = vld [vmem:[#allocation62_spill] sm:$0xff]  ;;  %v446_v22 = vmul.f32 %v4361_v42, %v4361_v42  ;;  %v482_v42 = vmul.f32 %v4390_v43, %v4390_v43 }
  0xb5   : > { %789 = vrot.lane.b32.xlu0 %v2681_v31, %s1850_s4  ;;  %v594_v14 = vadd.f32 %v582_v5, %v570_v19  ;;  %v4383_v19 = vld [vmem:[#allocation30_spill] sm:$0xff]  ;;  %v2962_v11 = vadd.f32 %v483_v0, %v471_v36  ;;  %v480_v0 = vmul.f32 %v4367_v57, %v4367_v57  ;;  %v450_v36 = vmul.f32 %v4374_v24, %v4374_v24 }
  0xb6   : > { %4373 = vst [vmem:[#allocation53_spill] sm:$0xff] %v2916_v50  ;;  %v478_v5 = vmul.f32 %v4383_v19, %v4383_v19  ;;  %v2952_v34 = vadd.f32 %v485_v62, %v473_v10  ;;  %v4388_v62 = vld [vmem:[#allocation44_spill] sm:$0xff] }
  0xb7   : > { %v2944_v56 = vadd.f32 %v4381_v59, %v594_v14  ;;  %4387 = vst [vmem:[#allocation17_spill] sm:$0xff] %v2962_v11  ;;  %v444_v14 = vmul.f32 %v4363_v1, %v4363_v1  ;;  %v456_v10 = vmul.f32 %v4388_v62, %v4388_v62  ;;  %v462_v1 = vmul.f32 %v4375_v53, %v4375_v53 }
  0xb8   : > { %795 = vrot.lane.b32.xlu1 %v2541_v13, %s1850_s4  ;;  %4385 = vst [vmem:[#allocation25_spill] sm:$0xff] %v2952_v34 }
  0xb9   : > { %793 = vrot.lane.b32.xlu0 %v2688_v45, %s1850_s4  ;;  %4382 = vst [vmem:[#allocation55_spill] sm:$0xff] %v2944_v56  ;;  %v468_v41 = vadd.f32 %v456_v10, %v444_v14  ;;  %v474_v24 = vadd.f32 %v462_v1, %v450_v36 }
  0xbb   : > { %v2996_v19 = vadd.f32 %v480_v0, %v468_v41 }
  0xbc   : > { %799 = vrot.lane.b32.xlu1 %v2582_v15, %s1850_s4 }
  0xbd   : > { %797 = vrot.lane.b32.xlu0 %v2602_v6, %s1850_s4  ;;  %v592_v6 = vadd.f32 %v4380_v7, %v568_v16  ;;  %v458_v16 = vmul.f32 %v4362_v27, %v4362_v27  ;;  %v4392_v7 = vld [vmem:[#allocation50_spill] sm:$0xff]  ;;  %4395 = vst [vmem:[#allocation26_spill] sm:$0xff] %v2996_v19 }
  0xbe   : > { %v460_v59 = vmul.f32 %v4392_v7, %v4392_v7 }
  0xbf   : > { %v2948_v54 = vadd.f32 %v604_v35, %v592_v6  ;;  %v464_v6 = vadd.f32 %v452_v30, %v440_v20  ;;  %v2968_v35 = vadd.f32 %v478_v5, %v466_v26  ;;  %v470_v27 = vadd.f32 %v458_v16, %v446_v22  ;;  %v4394_v26 = vld [vmem:[#allocation49_spill] sm:$0xff] }
  0xc0   : > { %863 = vrot.lane.b32.xlu1 %v2890_v17, %s1849_s19  ;;  %v448_v30 = vmul.f32 %v4377_v61, %v4377_v61  ;;  %v486_v53 = vmul.f32 %v4394_v26, %v4394_v26  ;;  %v484_v61 = vmul.f32 %v4378_v4, %v4378_v4 }
  0xc1   : > { %861 = vrot.lane.b32.xlu0 %v2905_v55, %s1849_s19  ;;  %4384 = vst [vmem:[#allocation18_spill] sm:$0xff] %v2948_v54  ;;  %4389 = vst [vmem:[#allocation58_spill] sm:$0xff] %v2968_v35  ;;  %v2982_v20 = vadd.f32 %v476_v21, %v464_v6  ;;  %v2990_v57 = vadd.f32 %v482_v42, %v470_v27 }
  0xc2   : > { %v472_v5 = vadd.f32 %v460_v59, %v448_v30  ;;  %v3002_v21 = vadd.f32 %v486_v53, %v474_v24  ;;  %v4398_v24 = vld [vmem:[#allocation73_spill] sm:$0xff] }
  0xc3   : > { %4391 = vst [vmem:[#allocation33_spill] sm:$0xff] %v2982_v20  ;;  %4393 = vst [vmem:[#allocation57_spill] sm:$0xff] %v2990_v57 }
  0xc4   : > { %867 = vrot.lane.b32.xlu1 %v2922_v40, %s1849_s19  ;;  %4396 = vst [vmem:[#allocation35_spill] sm:$0xff] %v3002_v21  ;;  %v3006_v22 = vadd.f32 %v484_v61, %v472_v5 }
  0xc5   : > { %865 = vrot.lane.b32.xlu0 %v4386_v52, %s1849_s19 }
  0xc6   : > { %4397 = vst [vmem:[#allocation23_spill] sm:$0xff] %v3006_v22 }
  0xc8   : > { %871 = vrot.lane.b32.xlu1 %v2952_v34, %s1849_s19 }
  0xc9   : > { %869 = vrot.lane.b32.xlu0 %v2962_v11, %s1849_s19 }
  0xcc   : > { %875 = vrot.lane.b32.xlu1 %v2968_v35, %s1849_s19 }
  0xcd   : > { %873 = vrot.lane.b32.xlu0 %v2982_v20, %s1849_s19 }
  0xd0   : > { %879 = vrot.lane.b32.xlu1 %v2990_v57, %s1849_s19 }
  0xd1   : > { %877 = vrot.lane.b32.xlu0 %v2996_v19, %s1849_s19 }
  0xd2   : > { %v3008_v16 = vpop.permute.xlu1 %625 }
  0xd3   : > { %v3010_v6 = vpop.permute.xlu0 %621 }
  0xd4   : > { %883 = vrot.lane.b32.xlu1 %v3002_v21, %s1849_s19 }
  0xd5   : > { %881 = vrot.lane.b32.xlu0 %v3006_v22, %s1849_s19 }
  0xd6   : > { %v630_v4 = vpop.permute.xlu1 %629 }
  0xd7   : > { %v3016_v14 = vpop.permute.xlu0 %619 }
  0xd8   : > { %899 = vrot.lane.b32.xlu1 %v2890_v17, %s1850_s4  ;;  %v4400_v17 = vld [vmem:[#allocation51_spill] sm:$0xff] }
  0xd9   : > { %897 = vrot.lane.b32.xlu0 %v2905_v55, %s1850_s4 }
  0xda   : > { %v3022_v62 = vpop.permute.xlu1 %633 }
  0xdb   : > { %v628_v10 = vpop.permute.xlu0 %627 }
  0xdc   : > { %903 = vrot.lane.b32.xlu1 %v2922_v40, %s1850_s4 }
  0xdd   : > { %901 = vrot.lane.b32.xlu0 %v4386_v52, %s1850_s4 }
  0xde   : > { %v3028_v43 = vpop.permute.xlu1 %637 }
  0xdf   : > { %v3030_v42 = vpop.permute.xlu0 %631 }
  0xe0   : > { %907 = vrot.lane.b32.xlu1 %v2952_v34, %s1850_s4 }
  0xe1   : > { %905 = vrot.lane.b32.xlu0 %v2962_v11, %s1850_s4  ;;  %v4399_v11 = vlaneseq }
  0xe2   : > { %v3036_v27 = vpop.permute.xlu1 %623 }
  0xe3   : > { %v3038_v0 = vpop.permute.xlu0 %635  ;;  %v3073_v34 = vand.u32 127, %v4399_v11 }
  0xe4   : > { %911 = vrot.lane.b32.xlu1 %v2968_v35, %s1850_s4 }
  0xe5   : > { %909 = vrot.lane.b32.xlu0 %v2982_v20, %s1850_s4  ;;  %vm643_vm4 = vcmp.lt.s32.totalorder %v3073_v34, 1  ;;  %vm241_vm5 = vcmp.eq.s32.totalorder %v3073_v34, 0  ;;  %vm680_vm7 = vcmp.lt.s32.totalorder %v3073_v34, 127 }
  0xe6   : > { %v642_v36 = vpop.permute.xlu1 %641 }
  0xe7   : > { %v640_v1 = vpop.permute.xlu0 %639  ;;  %v649_v11 = vsel %vm643_vm4, %v630_v4, %v642_v36 }
  0xe8   : > { %915 = vrot.lane.b32.xlu1 %v2990_v57, %s1850_s4  ;;  %v648_v55 = vsel %vm643_vm4, %v628_v10, %v640_v1  ;;  %v728_v20 = vadd.f32 %v649_v11, %v4400_v17 }
  0xe9   : > { %913 = vrot.lane.b32.xlu0 %v2996_v19, %s1850_s4  ;;  %v655_v19 = vsel %vm643_vm4, %v642_v36, %v630_v4  ;;  %v654_v4 = vsel %vm643_vm4, %v640_v1, %v628_v10 }
  0xea   : > { %v3048_v41 = vpop.permute.xlu1 %658 }
  0xeb   : > { %v3050_v30 = vpop.permute.xlu0 %656 }
  0xec   : > { %919 = vrot.lane.b32.xlu1 %v3002_v21, %s1850_s4 }
  0xed   : > { %917 = vrot.lane.b32.xlu0 %v3006_v22, %s1850_s4  ;;  %v3082_v22 = vadd.s32 128, %v3073_v34 }
  0xee   : > { %v3056_v7 = vpop.permute.xlu1 %662 }
  0xef   : > { %v3058_v59 = vpop.permute.xlu0 %660  ;;  %vm244_vm6 = vcmp.eq.s32.totalorder %v3082_v22, 255 }
  0xf0   : > { %983 = vrot.lane.b32.xlu1 %v4398_v24, %s1849_s19 }
  0xf1   : > { %981 = vrot.lane.b32.xlu0 %v2712_v9, %s1849_s19 }
  0xf2   : > { %v667_v26 = vpop.permute.xlu1 %666 }
  0xf3   : > { %v665_v53 = vpop.permute.xlu0 %664 }
  0xf4   : > { %987 = vrot.lane.b32.xlu1 %v2718_v33, %s1849_s19 }
  0xf5   : > { %985 = vrot.lane.b32.xlu0 %v2724_v51, %s1849_s19 }
  0xf6   : > { %v3068_v5 = vpop.permute.xlu1 %670 }
  0xf7   : > { %v3070_v61 = vpop.permute.xlu0 %668 }
  0xf8   : > { %991 = vrot.lane.b32.xlu1 %v2734_v3, %s1849_s19 }
  0xf9   : > { %989 = vrot.lane.b32.xlu0 %v2748_v32, %s1849_s19 }
  0xfa   : > { %v3079_v52 = vpop.permute.xlu1 %674 }
  0xfb   : > { %v3084_v21 = vpop.permute.xlu0 %672 }
  0xfc   : > { %995 = vrot.lane.b32.xlu1 %v2754_v2, %s1849_s19 }
  0xfd   : > { %993 = vrot.lane.b32.xlu0 %v2762_v48, %s1849_s19 }
  0xfe   : > { %v679_v40 = vpop.permute.xlu1 %678 }
  0xff   : > { %v677_v57 = vpop.permute.xlu0 %676  ;;  %v686_v35 = vsel %vm680_vm7, %v667_v26, %v679_v40  ;;  %v692_v58 = vsel %vm680_vm7, %v679_v40, %v667_v26  ;;  %v726_v40 = vadd.f32 %v648_v55, %v4401_v63  ;;  %v4402_v26 = vld [vmem:[#allocation27_spill] sm:$0xff] }
 0x100   : > { %v685_v54 = vsel %vm680_vm7, %v665_v53, %v677_v57  ;;  %999 = vrot.lane.b32.xlu1 %v2772_v49, %s1849_s19  ;;  %v703_v36 = vsel %vm241_vm5, %v686_v35, %v655_v19  ;;  %v716_v17 = vsel %vm244_vm6, %v649_v11, %v692_v58  ;;  %v691_v15 = vsel %vm680_vm7, %v677_v57, %v665_v53  ;;  %v4403_v11 = vld [vmem:[#allocation34_spill] sm:$0xff] }
 0x101   : > { %997 = vrot.lane.b32.xlu0 %v2784_v38, %s1849_s19  ;;  %v727_v56 = vadd.f32 %v703_v36, %v4402_v26  ;;  %v3119_v8 = vadd.f32 %v728_v20, %v716_v17  ;;  %v701_v10 = vsel %vm241_vm5, %v685_v54, %v654_v4  ;;  %v714_v19 = vsel %vm244_vm6, %v648_v55, %v691_v15  ;;  %v4404_v20 = vld [vmem:[#allocation83_spill] sm:$0xff]  ;;  %v4405_v36 = vld [vmem:[#allocation22_spill] sm:$0xff] }
 0x102   : > { %v744_v45 = vpop.permute.xlu1 %743  ;;  %v725_v50 = vadd.f32 %v701_v10, %v4403_v11  ;;  %v3130_v63 = vadd.f32 %v726_v40, %v714_v19 }
 0x103   : > { %v742_v58 = vpop.permute.xlu0 %741  ;;  %v3127_v1 = vadd.f32 %v727_v56, %v686_v35 }
 0x104   : > { %1003 = vrot.lane.b32.xlu1 %v4404_v20, %s1849_s19  ;;  %v3136_v57 = vadd.f32 %v725_v50, %v685_v54 }
 0x105   : > { %1001 = vrot.lane.b32.xlu0 %v4405_v36, %s1849_s19 }
 0x106   : > { %4406 = vst [vmem:[#allocation16_spill] sm:$0xff] %v3136_v57  ;;  %v748_v53 = vpop.permute.xlu1 %747 }
 0x107   : > { %v746_v4 = vpop.permute.xlu0 %745 }
 0x108   : > { %1019 = vrot.lane.b32.xlu1 %v4398_v24, %s1850_s4  ;;  %v4409_v24 = vld [vmem:[#allocation32_spill] sm:$0xff] }
 0x109   : > { %1017 = vrot.lane.b32.xlu0 %v2712_v9, %s1850_s4 }
 0x10a   : > { %v752_v15 = vpop.permute.xlu1 %751 }
 0x10b   : > { %v750_v55 = vpop.permute.xlu0 %749 }
 0x10c   : > { %1023 = vrot.lane.b32.xlu1 %v2718_v33, %s1850_s4  ;;  %v687_v33 = vsel %vm680_vm7, %v3070_v61, %v3050_v30 }
 0x10d   : > { %1021 = vrot.lane.b32.xlu0 %v2724_v51, %s1850_s4  ;;  %v688_v51 = vsel %vm680_vm7, %v3068_v5, %v3048_v41 }
 0x10e   : > { %v756_v56 = vpop.permute.xlu1 %755 }
 0x10f   : > { %v3148_v50 = vsel %vm643_vm4, %v744_v45, %v756_v56  ;;  %v3152_v54 = vsel %vm643_vm4, %v756_v56, %v744_v45  ;;  %v754_v35 = vpop.permute.xlu0 %753 }
 0x110   : > { %v3156_v17 = vsel %vm643_vm4, %v742_v58, %v754_v35  ;;  %v3160_v40 = vsel %vm643_vm4, %v754_v35, %v742_v58  ;;  %1027 = vrot.lane.b32.xlu1 %v2734_v3, %s1850_s4 }
 0x111   : > { %1025 = vrot.lane.b32.xlu0 %v2748_v32, %s1850_s4 }
 0x112   : > { %v760_v26 = vpop.permute.xlu1 %759 }
 0x113   : > { %v3168_v45 = vsel %vm643_vm4, %v748_v53, %v760_v26  ;;  %v3172_v10 = vsel %vm643_vm4, %v760_v26, %v748_v53  ;;  %v758_v19 = vpop.permute.xlu0 %757  ;;  %v682_v53 = vsel %vm680_vm7, %v3048_v41, %v3068_v5  ;;  %v4407_v41 = vld [vmem:[#allocation21_spill] sm:$0xff] }
 0x114   : > { %v3176_v58 = vsel %vm643_vm4, %v746_v4, %v758_v19  ;;  %v3180_v11 = vsel %vm643_vm4, %v758_v19, %v746_v4  ;;  %1031 = vrot.lane.b32.xlu1 %v2754_v2, %s1850_s4  ;;  %v681_v19 = vsel %vm680_vm7, %v3050_v30, %v3070_v61 }
 0x115   : > { %1029 = vrot.lane.b32.xlu0 %v2762_v48, %s1850_s4 }
 0x116   : > { %v764_v56 = vpop.permute.xlu1 %763 }
 0x117   : > { %v3192_v35 = vsel %vm643_vm4, %v752_v15, %v764_v56  ;;  %v3196_v4 = vsel %vm643_vm4, %v764_v56, %v752_v15  ;;  %v762_v26 = vpop.permute.xlu0 %761  ;;  %v651_v15 = vsel %vm643_vm4, %v3022_v62, %v3010_v6  ;;  %v650_v56 = vsel %vm643_vm4, %v3030_v42, %v3016_v14 }
 0x118   : > { %v3204_v32 = vsel %vm643_vm4, %v750_v55, %v762_v26  ;;  %v3208_v3 = vsel %vm643_vm4, %v762_v26, %v750_v55  ;;  %1035 = vrot.lane.b32.xlu1 %v2772_v49, %s1850_s4  ;;  %v695_v55 = vsel %vm241_vm5, %v682_v53, %v651_v15  ;;  %v693_v9 = vsel %vm241_vm5, %v681_v19, %v650_v56 }
 0x119   : > { %1033 = vrot.lane.b32.xlu0 %v2784_v38, %s1850_s4  ;;  %v645_v15 = vsel %vm643_vm4, %v3010_v6, %v3022_v62  ;;  %v644_v49 = vsel %vm643_vm4, %v3016_v14, %v3030_v42  ;;  %v719_v5 = vadd.f32 %v695_v55, %v4407_v41  ;;  %v4408_v6 = vld [vmem:[#allocation29_spill] sm:$0xff]  ;;  %v4410_v14 = vld [vmem:[#allocation43_spill] sm:$0xff]  ;;  %v3260_v55 = vsel %vm680_vm7, %v3056_v7, %v3079_v52 }
 0x11a   : > { %v780_v26 = vpop.permute.xlu1 %779  ;;  %v708_v30 = vsel %vm244_vm6, %v645_v15, %v688_v51  ;;  %v706_v61 = vsel %vm244_vm6, %v644_v49, %v687_v33  ;;  %v717_v62 = vadd.f32 %v693_v9, %v4408_v6  ;;  %v720_v48 = vadd.f32 %v645_v15, %v4409_v24 }
 0x11b   : > { %v778_v38 = vpop.permute.xlu0 %777  ;;  %v718_v42 = vadd.f32 %v644_v49, %v4410_v14  ;;  %v690_v51 = vsel %vm680_vm7, %v3079_v52, %v3056_v7  ;;  %v647_v9 = vsel %vm643_vm4, %v3008_v16, %v3028_v43  ;;  %v731_v33 = vadd.f32 %v719_v5, %v682_v53  ;;  %v4411_v5 = vld [vmem:[#allocation42_spill] sm:$0xff]  ;;  %v4412_v14 = vld [vmem:[#allocation20_spill] sm:$0xff] }
 0x11c   : > { %1039 = vrot.lane.b32.xlu1 %v4404_v20, %s1850_s4  ;;  %v732_v49 = vadd.f32 %v720_v48, %v708_v30  ;;  %v653_v15 = vsel %vm643_vm4, %v3028_v43, %v3008_v16  ;;  %v729_v52 = vadd.f32 %v717_v62, %v681_v19  ;;  %v712_v53 = vsel %vm244_vm6, %v647_v9, %v690_v51 }
 0x11d   : > { %1037 = vrot.lane.b32.xlu0 %v4405_v36, %s1850_s4  ;;  %v730_v24 = vadd.f32 %v718_v42, %v706_v61  ;;  %v699_v41 = vsel %vm241_vm5, %v3260_v55, %v653_v15  ;;  %v724_v30 = vadd.f32 %v647_v9, %v4411_v5  ;;  %v646_v61 = vsel %vm643_vm4, %v3036_v27, %v3038_v0 }
 0x11e   : > { %v784_v56 = vpop.permute.xlu1 %783  ;;  %v652_v16 = vsel %vm643_vm4, %v3038_v0, %v3036_v27  ;;  %v1247_v43 = vmul.f32 %v731_v33, %v731_v33  ;;  %v1248_v19 = vmul.f32 %v732_v49, %v732_v49  ;;  %v1245_v62 = vmul.f32 %v729_v52, %v729_v52 }
 0x11f   : > { %v3254_v2 = vpop.permute.xlu0 %781  ;;  %v1246_v6 = vmul.f32 %v730_v24, %v730_v24  ;;  %v723_v42 = vadd.f32 %v699_v41, %v4412_v14  ;;  %v3301_v51 = vadd.f32 %v724_v30, %v712_v53  ;;  %v683_v9 = vsel %vm680_vm7, %v3058_v59, %v3084_v21 }
 0x120   : > { %1103 = vrot.lane.b32.xlu1 %v2808_v44, %s1849_s19  ;;  %v840_v27 = vadd.f32 %v3148_v50, %v2672_v12  ;;  %v838_v0 = vadd.f32 %v3156_v17, %v2681_v31 }
 0x121   : > { %1101 = vrot.lane.b32.xlu0 %v2821_v28, %s1849_s19 }
 0x122   : > { %v3278_v7 = vpop.permute.xlu1 %787 }
 0x123   : > { %v3285_v48 = vpop.permute.xlu0 %785 }
 0x124   : > { %1107 = vrot.lane.b32.xlu1 %v2828_v46, %s1849_s19 }
 0x125   : > { %1105 = vrot.lane.b32.xlu0 %v2830_v25, %s1849_s19 }
 0x126   : > { %v792_v15 = vpop.permute.xlu1 %791 }
 0x127   : > { %v802_v5 = vsel %vm680_vm7, %v780_v26, %v792_v15  ;;  %v808_v41 = vsel %vm680_vm7, %v792_v15, %v780_v26  ;;  %v790_v53 = vpop.permute.xlu0 %789 }
 0x128   : > { %v815_v30 = vsel %vm241_vm5, %v802_v5, %v3152_v54  ;;  %v828_v14 = vsel %vm244_vm6, %v3148_v50, %v808_v41  ;;  %v801_v12 = vsel %vm680_vm7, %v778_v38, %v790_v53  ;;  %v807_v31 = vsel %vm680_vm7, %v790_v53, %v778_v38  ;;  %1111 = vrot.lane.b32.xlu1 %v2834_v47, %s1849_s19 }
 0x129   : > { %v839_v26 = vadd.f32 %v815_v30, %v4339_v60  ;;  %v852_v15 = vadd.f32 %v840_v27, %v828_v14  ;;  %v813_v54 = vsel %vm241_vm5, %v801_v12, %v3160_v40  ;;  %v826_v50 = vsel %vm244_vm6, %v3156_v17, %v807_v31  ;;  %1109 = vrot.lane.b32.xlu0 %v2836_v18, %s1849_s19 }
 0x12a   : > { %v689_v38 = vsel %vm680_vm7, %v3084_v21, %v3058_v59  ;;  %v697_v60 = vsel %vm241_vm5, %v683_v9, %v652_v16  ;;  %v837_v27 = vadd.f32 %v813_v54, %v4342_v29  ;;  %v850_v41 = vadd.f32 %v838_v0, %v826_v50  ;;  %v796_v53 = vpop.permute.xlu1 %795  ;;  %v4415_v29 = vld [vmem:[#allocation45_spill] sm:$0xff] }
 0x12b   : > { %v851_v40 = vadd.f32 %v839_v26, %v802_v5  ;;  %v3343_v30 = vmul.f32 %v852_v15, %v732_v49  ;;  %v1260_v14 = vmul.f32 %v852_v15, %v852_v15  ;;  %v804_v17 = vsel %vm680_vm7, %v784_v56, %v796_v53  ;;  %v794_v31 = vpop.permute.xlu0 %793  ;;  %v4418_v15 = vld [vmem:[#allocation47_spill] sm:$0xff] }
 0x12c   : > { %v849_v36 = vadd.f32 %v837_v27, %v801_v12  ;;  %v3347_v20 = vmul.f32 %v850_v41, %v730_v24  ;;  %v1258_v57 = vmul.f32 %v850_v41, %v850_v41  ;;  %v810_v21 = vsel %vm680_vm7, %v796_v53, %v784_v56  ;;  %1115 = vrot.lane.b32.xlu1 %v2868_v23, %s1849_s19  ;;  %v4422_v27 = vld [vmem:[#allocation68_spill] sm:$0xff] }
 0x12d   : > { %4413 = vst [vmem:[#allocation60_spill] sm:$0xff] %v3343_v30  ;;  %v721_v59 = vadd.f32 %v697_v60, %v4415_v29  ;;  %v3354_v16 = vmul.f32 %v851_v40, %v731_v33  ;;  %v1259_v49 = vmul.f32 %v851_v40, %v851_v40  ;;  %v3356_v0 = vadd.f32 %v1260_v14, %v1248_v19 }
 0x12e   : > { %4414 = vst [vmem:[#allocation41_spill] sm:$0xff] %v3347_v20  ;;  %1113 = vrot.lane.b32.xlu0 %v2870_v39, %s1849_s19  ;;  %v710_v24 = vsel %vm244_vm6, %v646_v61, %v689_v38  ;;  %v3362_v5 = vmul.f32 %v849_v36, %v729_v52  ;;  %v1257_v12 = vmul.f32 %v849_v36, %v849_v36  ;;  %v800_v26 = vpop.permute.xlu1 %799 }
 0x12f   : > { %4416 = vst [vmem:[#allocation24_spill] sm:$0xff] %v3354_v16  ;;  %v3364_v56 = vadd.f32 %v1258_v57, %v1246_v6  ;;  %v722_v54 = vadd.f32 %v646_v61, %v4418_v15  ;;  %v3367_v50 = vadd.f32 %v1259_v49, %v1247_v43  ;;  %v3369_v33 = vpop.permute.xlu0 %797  ;;  %v735_v19 = vadd.f32 %v723_v42, %v3260_v55  ;;  %v4419_v43 = vld [vmem:[#allocation53_spill] sm:$0xff]  ;;  %v4420_v6 = vld [vmem:[#allocation72_spill] sm:$0xff]  ;;  %v4457_v16 = vld [vmem:[#allocation82_spill] sm:$0xff] }
 0x130   : > { %4417 = vst [vmem:[#allocation31_spill] sm:$0xff] %v3362_v5  ;;  %v1252_v60 = vmul.f32 %v3301_v51, %v3301_v51  ;;  %v844_v38 = vadd.f32 %v3168_v45, %v2541_v13  ;;  %v3376_v52 = vadd.f32 %v1257_v12, %v1245_v62  ;;  %1119 = vrot.lane.b32.xlu1 %v2914_v37, %s1849_s19  ;;  %v4421_v62 = vld [vmem:[#allocation61_spill] sm:$0xff] }
 0x131   : > { %v733_v36 = vadd.f32 %v721_v59, %v683_v9  ;;  %v734_v57 = vadd.f32 %v722_v54, %v710_v24  ;;  %v819_v61 = vsel %vm241_vm5, %v804_v17, %v3172_v10  ;;  %v832_v55 = vsel %vm244_vm6, %v3168_v45, %v810_v21  ;;  %v4425_v12 = vld [vmem:[#allocation69_spill] sm:$0xff] }
 0x132   : > { %1117 = vrot.lane.b32.xlu0 %v4419_v43, %s1849_s19  ;;  %v842_v13 = vadd.f32 %v3176_v58, %v4420_v6  ;;  %v848_v42 = vadd.f32 %v3192_v35, %v4421_v62  ;;  %v843_v9 = vadd.f32 %v819_v61, %v4422_v27  ;;  %v856_v41 = vadd.f32 %v844_v38, %v832_v55  ;;  %v864_v53 = vpop.permute.xlu1 %863  ;;  %v4428_v6 = vld [vmem:[#allocation70_spill] sm:$0xff] }
 0x133   : > { %v803_v10 = vsel %vm680_vm7, %v3254_v2, %v794_v31  ;;  %v809_v45 = vsel %vm680_vm7, %v794_v31, %v3254_v2  ;;  %v806_v40 = vsel %vm680_vm7, %v3278_v7, %v800_v26  ;;  %v812_v14 = vsel %vm680_vm7, %v800_v26, %v3278_v7  ;;  %v862_v21 = vpop.permute.xlu0 %861  ;;  %v4424_v2 = vld [vmem:[#allocation55_spill] sm:$0xff] }
 0x134   : > { %v855_v29 = vadd.f32 %v843_v9, %v804_v17  ;;  %v3406_v59 = vmul.f32 %v856_v41, %v3301_v51  ;;  %v1264_v49 = vmul.f32 %v856_v41, %v856_v41  ;;  %v817_v24 = vsel %vm241_vm5, %v803_v10, %v3180_v11  ;;  %1123 = vrot.lane.b32.xlu1 %v4424_v2, %s1849_s19  ;;  %v4426_v17 = vld [vmem:[#allocation18_spill] sm:$0xff] }
 0x135   : > { %v830_v31 = vsel %vm244_vm6, %v3176_v58, %v809_v45  ;;  %v841_v15 = vadd.f32 %v817_v24, %v4425_v12  ;;  %v823_v7 = vsel %vm241_vm5, %v806_v40, %v3196_v4  ;;  %v836_v51 = vsel %vm244_vm6, %v3192_v35, %v812_v14 }
 0x136   : > { %4423 = vst [vmem:[#allocation59_spill] sm:$0xff] %v3406_v59  ;;  %1121 = vrot.lane.b32.xlu0 %v4426_v17, %s1849_s19  ;;  %v1251_v11 = vmul.f32 %v735_v19, %v735_v19  ;;  %v3425_v26 = vmul.f32 %v855_v29, %v735_v19  ;;  %v1263_v54 = vmul.f32 %v855_v29, %v855_v29  ;;  %v868_v58 = vpop.permute.xlu1 %867 }
 0x137   : > { %v3427_v38 = vadd.f32 %v1264_v49, %v1252_v60  ;;  %v853_v61 = vadd.f32 %v841_v15, %v803_v10  ;;  %v854_v55 = vadd.f32 %v842_v13, %v830_v31  ;;  %v847_v62 = vadd.f32 %v823_v7, %v4428_v6  ;;  %v866_v4 = vpop.permute.xlu0 %865 }
 0x138   : > { %4427 = vst [vmem:[#allocation39_spill] sm:$0xff] %v3425_v26  ;;  %v860_v27 = vadd.f32 %v848_v42, %v836_v51  ;;  %v1249_v9 = vmul.f32 %v733_v36, %v733_v36  ;;  %v1250_v41 = vmul.f32 %v734_v57, %v734_v57  ;;  %v3430_v45 = vadd.f32 %v1263_v54, %v1251_v11 }
 0x139   : > { %1139 = vrot.lane.b32.xlu1 %v2808_v44, %s1850_s4  ;;  %v3434_v35 = vmul.f32 %v853_v61, %v733_v36  ;;  %v3436_v19 = vmul.f32 %v854_v55, %v734_v57  ;;  %v1261_v60 = vmul.f32 %v853_v61, %v853_v61  ;;  %v1262_v14 = vmul.f32 %v854_v55, %v854_v55 }
 0x13a   : > { %1137 = vrot.lane.b32.xlu0 %v2821_v28, %s1850_s4  ;;  %v859_v13 = vadd.f32 %v847_v62, %v806_v40  ;;  %v3441_v42 = vmul.f32 %v860_v27, %v3119_v8  ;;  %v872_v10 = vpop.permute.xlu1 %871  ;;  %v1256_v29 = vmul.f32 %v3119_v8, %v3119_v8  ;;  %v1255_v57 = vmul.f32 %v3127_v1, %v3127_v1 }
 0x13b   : > { %4429 = vst [vmem:[#allocation46_spill] sm:$0xff] %v3434_v35  ;;  %4430 = vst [vmem:[#allocation38_spill] sm:$0xff] %v3436_v19  ;;  %v3445_v49 = vadd.f32 %v1261_v60, %v1249_v9  ;;  %v3447_v24 = vadd.f32 %v1262_v14, %v1250_v41  ;;  %v870_v36 = vpop.permute.xlu0 %869  ;;  %v1268_v40 = vmul.f32 %v860_v27, %v860_v27  ;;  %v4434_v27 = vld [vmem:[#allocation71_spill] sm:$0xff] }
 0x13c   : > { %4431 = vst [vmem:[#allocation48_spill] sm:$0xff] %v3441_v42  ;;  %v3452_v31 = vmul.f32 %v859_v13, %v3127_v1  ;;  %v1267_v12 = vmul.f32 %v859_v13, %v859_v13  ;;  %v805_v8 = vsel %vm680_vm7, %v3285_v48, %v3369_v33  ;;  %v4433_v1 = vld [vmem:[#allocation64_spill] sm:$0xff]  ;;  %v811_v54 = vsel %vm680_vm7, %v3369_v33, %v3285_v48 }
 0x13d   : > { %1143 = vrot.lane.b32.xlu1 %v2828_v46, %s1850_s4  ;;  %v3464_v7 = vadd.f32 %v1268_v40, %v1256_v29  ;;  %v846_v11 = vadd.f32 %v3204_v32, %v4433_v1  ;;  %v821_v61 = vsel %vm241_vm5, %v805_v8, %v3208_v3  ;;  %v834_v62 = vsel %vm244_vm6, %v3204_v32, %v811_v54  ;;  %v4444_v46 = vld [vmem:[#allocation28_spill] sm:$0xff] }
 0x13e   : > { %4432 = vst [vmem:[#allocation36_spill] sm:$0xff] %v3452_v31  ;;  %1141 = vrot.lane.b32.xlu0 %v2830_v25, %s1850_s4  ;;  %v3462_v15 = vadd.f32 %v1267_v12, %v1255_v57  ;;  %v876_v51 = vpop.permute.xlu1 %875  ;;  %v845_v9 = vadd.f32 %v821_v61, %v4434_v27  ;;  %v1254_v32 = vmul.f32 %v3130_v63, %v3130_v63 }
 0x13f   : > { %v886_v55 = vsel %vm643_vm4, %v864_v53, %v876_v51  ;;  %v874_v6 = vpop.permute.xlu0 %873  ;;  %v858_v41 = vadd.f32 %v846_v11, %v834_v62  ;;  %v892_v48 = vsel %vm643_vm4, %v876_v51, %v864_v53 }
 0x140   : > { %v885_v3 = vsel %vm643_vm4, %v862_v21, %v874_v6  ;;  %v891_v33 = vsel %vm643_vm4, %v874_v6, %v862_v21  ;;  %v857_v14 = vadd.f32 %v845_v9, %v805_v8  ;;  %v4436_v8 = vld [vmem:[#allocation16_spill] sm:$0xff] }
 0x141   : > { %1147 = vrot.lane.b32.xlu1 %v2834_v47, %s1850_s4  ;;  %v3494_v13 = vmul.f32 %v858_v41, %v3130_v63  ;;  %v1266_v29 = vmul.f32 %v858_v41, %v858_v41  ;;  %v1253_v63 = vmul.f32 %v4436_v8, %v4436_v8 }
 0x142   : > { %1145 = vrot.lane.b32.xlu0 %v2836_v18, %s1850_s4  ;;  %v880_v60 = vpop.permute.xlu1 %879  ;;  %v3509_v51 = vmul.f32 %v857_v14, %v4436_v8  ;;  %v1265_v1 = vmul.f32 %v857_v14, %v857_v14  ;;  %v4441_v8 = vld [vmem:[#allocation33_spill] sm:$0xff] }
 0x143   : > { %4435 = vst [vmem:[#allocation63_spill] sm:$0xff] %v3494_v13  ;;  %v878_v57 = vpop.permute.xlu0 %877  ;;  %v888_v53 = vsel %vm643_vm4, %v868_v58, %v880_v60  ;;  %v894_v12 = vsel %vm643_vm4, %v880_v60, %v868_v58  ;;  %v3511_v11 = vadd.f32 %v1266_v29, %v1254_v32 }
 0x144   : > { %v887_v40 = vsel %vm643_vm4, %v866_v4, %v878_v57  ;;  %v893_v21 = vsel %vm643_vm4, %v878_v57, %v866_v4  ;;  %4437 = vst [vmem:[#allocation62_spill] sm:$0xff] %v3509_v51  ;;  %v3515_v54 = vadd.f32 %v1265_v1, %v1253_v63  ;;  %v958_v63 = vadd.f32 %v885_v3, %v4441_v8  ;;  %v4442_v8 = vld [vmem:[#allocation65_spill] sm:$0xff] }
 0x145   : > { %1151 = vrot.lane.b32.xlu1 %v2868_v23, %s1850_s4  ;;  %4438 = vst [vmem:[#allocation30_spill] sm:$0xff] %v3511_v11 }
 0x146   : > { %1149 = vrot.lane.b32.xlu0 %v2870_v39, %s1850_s4  ;;  %v884_v58 = vpop.permute.xlu1 %883  ;;  %4439 = vst [vmem:[#allocation44_spill] sm:$0xff] %v3515_v54 }
 0x147   : > { %v882_v61 = vpop.permute.xlu0 %881  ;;  %v890_v4 = vsel %vm643_vm4, %v872_v10, %v884_v58  ;;  %v896_v6 = vsel %vm643_vm4, %v884_v58, %v872_v10 }
 0x148   : > { %v889_v62 = vsel %vm643_vm4, %v870_v36, %v882_v61  ;;  %v895_v27 = vsel %vm643_vm4, %v882_v61, %v870_v36  ;;  %v4440_v36 = vld [vmem:[#allocation58_spill] sm:$0xff] }
 0x149   : > { %1155 = vrot.lane.b32.xlu1 %v2914_v37, %s1850_s4  ;;  %v960_v57 = vadd.f32 %v886_v55, %v4440_v36  ;;  %v4454_v37 = vld [vmem:[#allocation80_spill] sm:$0xff] }
 0x14a   : > { %1153 = vrot.lane.b32.xlu0 %v4419_v43, %s1850_s4  ;;  %v900_v9 = vpop.permute.xlu1 %899  ;;  %v4490_v22 = vld [vmem:[#allocation63_spill] sm:$0xff] }
 0x14b   : > { %v898_v41 = vpop.permute.xlu0 %897 }
 0x14d   : > { %1159 = vrot.lane.b32.xlu1 %v4424_v2, %s1850_s4  ;;  %v4445_v2 = vld [vmem:[#allocation26_spill] sm:$0xff] }
 0x14e   : > { %1157 = vrot.lane.b32.xlu0 %v4426_v17, %s1850_s4  ;;  %v904_v10 = vpop.permute.xlu1 %903  ;;  %v962_v44 = vadd.f32 %v887_v40, %v4445_v2 }
 0x14f   : > { %v902_v60 = vpop.permute.xlu0 %901 }
 0x152   : > { %v908_v32 = vpop.permute.xlu1 %907 }
 0x153   : > { %v906_v14 = vpop.permute.xlu0 %905 }
 0x156   : > { %v912_v29 = vpop.permute.xlu1 %911 }
 0x157   : > { %v922_v1 = vsel %vm680_vm7, %v900_v9, %v912_v29  ;;  %v928_v58 = vsel %vm680_vm7, %v912_v29, %v900_v9  ;;  %v910_v61 = vpop.permute.xlu0 %909 }
 0x158   : > { %v935_v51 = vsel %vm241_vm5, %v922_v1, %v892_v48  ;;  %v948_v13 = vsel %vm244_vm6, %v886_v55, %v928_v58  ;;  %v921_v18 = vsel %vm680_vm7, %v898_v41, %v910_v61  ;;  %v927_v36 = vsel %vm680_vm7, %v910_v61, %v898_v41  ;;  %v4443_v48 = vld [vmem:[#allocation57_spill] sm:$0xff] }
 0x159   : > { %v959_v17 = vadd.f32 %v935_v51, %v4442_v8  ;;  %v3548_v47 = vadd.f32 %v960_v57, %v948_v13  ;;  %v933_v9 = vsel %vm241_vm5, %v921_v18, %v891_v33  ;;  %v946_v29 = vsel %vm244_vm6, %v885_v3, %v927_v36  ;;  %v4448_v36 = vld [vmem:[#allocation23_spill] sm:$0xff]  ;;  %v4449_v8 = vld [vmem:[#allocation66_spill] sm:$0xff] }
 0x15a   : > { %v964_v25 = vadd.f32 %v888_v53, %v4443_v48  ;;  %v957_v55 = vadd.f32 %v933_v9, %v4444_v46  ;;  %v3556_v58 = vadd.f32 %v958_v63, %v946_v29  ;;  %v916_v28 = vpop.permute.xlu1 %915 }
 0x15b   : > { %v3559_v41 = vadd.f32 %v959_v17, %v922_v1  ;;  %v924_v13 = vsel %vm680_vm7, %v904_v10, %v916_v28  ;;  %v930_v33 = vsel %vm680_vm7, %v916_v28, %v904_v10  ;;  %v914_v51 = vpop.permute.xlu0 %913  ;;  %v4446_v17 = vld [vmem:[#allocation56_spill] sm:$0xff] }
 0x15c   : > { %v3565_v57 = vadd.f32 %v957_v55, %v921_v18  ;;  %v939_v3 = vsel %vm241_vm5, %v924_v13, %v894_v12  ;;  %v952_v46 = vsel %vm244_vm6, %v888_v53, %v930_v33  ;;  %v923_v2 = vsel %vm680_vm7, %v902_v60, %v914_v51  ;;  %v4447_v18 = vld [vmem:[#allocation35_spill] sm:$0xff] }
 0x15d   : > { %v963_v63 = vadd.f32 %v939_v3, %v4446_v17  ;;  %v3574_v1 = vadd.f32 %v964_v25, %v952_v46  ;;  %v929_v61 = vsel %vm680_vm7, %v914_v51, %v902_v60  ;;  %v937_v28 = vsel %vm241_vm5, %v923_v2, %v893_v21 }
 0x15e   : > { %v968_v10 = vadd.f32 %v890_v4, %v4447_v18  ;;  %v966_v12 = vadd.f32 %v889_v62, %v4448_v36  ;;  %v950_v53 = vsel %vm244_vm6, %v887_v40, %v929_v61  ;;  %v961_v9 = vadd.f32 %v937_v28, %v4449_v8  ;;  %v920_v29 = vpop.permute.xlu1 %919 }
 0x15f   : > { %v3585_v48 = vadd.f32 %v963_v63, %v924_v13  ;;  %v3587_v25 = vadd.f32 %v962_v44, %v950_v53  ;;  %v926_v60 = vsel %vm680_vm7, %v908_v32, %v920_v29  ;;  %v932_v21 = vsel %vm680_vm7, %v920_v29, %v908_v32  ;;  %v918_v55 = vpop.permute.xlu0 %917  ;;  %v4450_v44 = vld [vmem:[#allocation25_spill] sm:$0xff] }
 0x160   : > { %v3593_v33 = vadd.f32 %v961_v9, %v923_v2  ;;  %v943_v51 = vsel %vm241_vm5, %v926_v60, %v896_v6  ;;  %v956_v40 = vsel %vm244_vm6, %v890_v4, %v932_v21  ;;  %v925_v13 = vsel %vm680_vm7, %v906_v14, %v918_v55  ;;  %v4451_v6 = vld [vmem:[#allocation17_spill] sm:$0xff] }
 0x161   : > { %v967_v3 = vadd.f32 %v943_v51, %v4450_v44  ;;  %v3602_v46 = vadd.f32 %v968_v10, %v956_v40  ;;  %v931_v17 = vsel %vm680_vm7, %v918_v55, %v906_v14  ;;  %v941_v32 = vsel %vm241_vm5, %v925_v13, %v895_v27 }
 0x162   : > { %v954_v2 = vsel %vm244_vm6, %v889_v62, %v931_v17  ;;  %v965_v63 = vadd.f32 %v941_v32, %v4451_v6  ;;  %v984_v61 = vpop.permute.xlu1 %983 }
 0x163   : > { %v3611_v4 = vadd.f32 %v967_v3, %v926_v60  ;;  %v3613_v28 = vadd.f32 %v966_v12, %v954_v2  ;;  %v982_v18 = vpop.permute.xlu0 %981 }
 0x164   : > { %v3615_v36 = vadd.f32 %v965_v63, %v925_v13 }
 0x166   : > { %4452 = vst [vmem:[#allocation40_spill] sm:$0xff] %v3615_v36  ;;  %v988_v10 = vpop.permute.xlu1 %987 }
 0x167   : > { %v986_v53 = vpop.permute.xlu0 %985 }
 0x16a   : > { %v992_v8 = vpop.permute.xlu1 %991 }
 0x16b   : > { %v990_v14 = vpop.permute.xlu0 %989 }
 0x16e   : > { %v996_v9 = vpop.permute.xlu1 %995 }
 0x16f   : > { %v1006_v27 = vsel %vm643_vm4, %v984_v61, %v996_v9  ;;  %v1012_v62 = vsel %vm643_vm4, %v996_v9, %v984_v61  ;;  %v994_v29 = vpop.permute.xlu0 %993 }
 0x170   : > { %v1005_v60 = vsel %vm643_vm4, %v982_v18, %v994_v29  ;;  %v1011_v12 = vsel %vm643_vm4, %v994_v29, %v982_v18 }
 0x171   : > { %v1078_v39 = vadd.f32 %v1005_v60, %v4454_v37  ;;  %v4455_v37 = vld [vmem:[#allocation73_spill] sm:$0xff] }
 0x172   : > { %v1000_v21 = vpop.permute.xlu1 %999 }
 0x173   : > { %v1008_v55 = vsel %vm643_vm4, %v988_v10, %v1000_v21  ;;  %v1014_v51 = vsel %vm643_vm4, %v1000_v21, %v988_v10  ;;  %v998_v40 = vpop.permute.xlu0 %997  ;;  %v3657_v21 = vadd.f32 0.0081, %v3367_v50 }
 0x174   : > { %v3631_v13 = vsel %vm643_vm4, %v986_v53, %v998_v40  ;;  %v1013_v44 = vsel %vm643_vm4, %v998_v40, %v986_v53  ;;  %v3660_v40 = vadd.f32 0.0081, %v3376_v52 }
 0x176   : > { %v1004_v3 = vpop.permute.xlu1 %1003 }
 0x177   : > { %v3637_v17 = vsel %vm643_vm4, %v992_v8, %v1004_v3  ;;  %v3641_v32 = vsel %vm643_vm4, %v1004_v3, %v992_v8  ;;  %v1002_v2 = vpop.permute.xlu0 %1001  ;;  %v1344_v8 = vadd.f32 0.0081, %v3356_v0  ;;  %v1342_v3 = vadd.f32 0.0081, %v3364_v56 }
 0x178   : > { %v3645_v6 = vsel %vm643_vm4, %v990_v14, %v1002_v2  ;;  %v3649_v63 = vsel %vm643_vm4, %v1002_v2, %v990_v14  ;;  %v4453_v2 = vld [vmem:[#allocation79_spill] sm:$0xff] }
 0x179   : > { %v1080_v43 = vadd.f32 %v1006_v27, %v4453_v2 }
 0x17a   : > { %v1020_v61 = vpop.permute.xlu1 %1019 }
 0x17b   : > { %v1018_v18 = vpop.permute.xlu0 %1017 }
 0x17e   : > { %v1024_v10 = vpop.permute.xlu1 %1023 }
 0x17f   : > { %v1022_v53 = vpop.permute.xlu0 %1021 }
 0x182   : > { %v3651_v9 = vpop.permute.xlu1 %1027 }
 0x183   : > { %v3653_v29 = vpop.permute.xlu0 %1025 }
 0x186   : > { %v1032_v14 = vpop.permute.xlu1 %1031 }
 0x187   : > { %v1042_v23 = vsel %vm680_vm7, %v1020_v61, %v1032_v14  ;;  %v1048_v31 = vsel %vm680_vm7, %v1032_v14, %v1020_v61  ;;  %v1030_v42 = vpop.permute.xlu0 %1029  ;;  %v4456_v14 = vld [vmem:[#allocation81_spill] sm:$0xff] }
 0x188   : > { %v1055_v19 = vsel %vm241_vm5, %v1042_v23, %v1012_v62  ;;  %v1068_v35 = vsel %vm244_vm6, %v1006_v27, %v1048_v31  ;;  %v1041_v59 = vsel %vm680_vm7, %v1018_v18, %v1030_v42  ;;  %v1047_v2 = vsel %vm680_vm7, %v1030_v42, %v1018_v18  ;;  %v4458_v27 = vld [vmem:[#allocation74_spill] sm:$0xff] }
 0x189   : > { %v1079_v26 = vadd.f32 %v1055_v19, %v4455_v37  ;;  %v1092_v20 = vadd.f32 %v1080_v43, %v1068_v35  ;;  %v1053_v5 = vsel %vm241_vm5, %v1041_v59, %v1011_v12  ;;  %v1066_v61 = vsel %vm244_vm6, %v1005_v60, %v1047_v2 }
 0x18a   : > { %v1084_v62 = vadd.f32 %v1008_v55, %v4456_v14  ;;  %v1082_v31 = vadd.f32 %v3631_v13, %v4457_v16  ;;  %v1077_v30 = vadd.f32 %v1053_v5, %v4458_v27  ;;  %v1090_v54 = vadd.f32 %v1078_v39, %v1066_v61  ;;  %v1036_v11 = vpop.permute.xlu1 %1035  ;;  %v4460_v27 = vld [vmem:[#allocation76_spill] sm:$0xff] }
 0x18b   : > { %v1091_v36 = vadd.f32 %v1079_v26, %v1042_v23  ;;  %v1356_v42 = vadd.f32 %v1092_v20, %v3548_v47  ;;  %v1044_v43 = vsel %vm680_vm7, %v1024_v10, %v1036_v11  ;;  %v1050_v35 = vsel %vm680_vm7, %v1036_v11, %v1024_v10  ;;  %v1034_v19 = vpop.permute.xlu0 %1033  ;;  %v4459_v47 = vld [vmem:[#allocation75_spill] sm:$0xff] }
 0x18c   : > { %v1089_v60 = vadd.f32 %v1077_v30, %v1041_v59  ;;  %v1354_v12 = vadd.f32 %v1090_v54, %v3556_v58  ;;  %v1059_v16 = vsel %vm241_vm5, %v1044_v43, %v1014_v51  ;;  %v1072_v39 = vsel %vm244_vm6, %v1008_v55, %v1050_v35 }
 0x18d   : > { %v1355_v23 = vadd.f32 %v1091_v36, %v3559_v41  ;;  %v1368_v5 = vmul.f32 9.0, %v1356_v42  ;;  %v1083_v20 = vadd.f32 %v1059_v16, %v4459_v47  ;;  %v1096_v26 = vadd.f32 %v1084_v62, %v1072_v39 }
 0x18e   : > { %v1353_v18 = vadd.f32 %v1089_v60, %v3565_v57  ;;  %v1366_v2 = vmul.f32 9.0, %v1354_v12  ;;  %v1043_v30 = vsel %vm680_vm7, %v1022_v53, %v1034_v19  ;;  %v1049_v59 = vsel %vm680_vm7, %v1034_v19, %v1022_v53  ;;  %v1040_v11 = vpop.permute.xlu1 %1039 }
 0x18f   : > { %v1367_v54 = vmul.f32 9.0, %v1355_v23  ;;  %v1380_v58 = vsub.f32 %v1368_v5, %v3356_v0  ;;  %v1095_v55 = vadd.f32 %v1083_v20, %v1044_v43  ;;  %v1360_v41 = vadd.f32 %v1096_v26, %v3574_v1  ;;  %v1038_v36 = vpop.permute.xlu0 %1037 }
 0x190   : > { %v1365_v51 = vmul.f32 9.0, %v1353_v18  ;;  %v1378_v10 = vsub.f32 %v1366_v2, %v3364_v56  ;;  %v1057_v57 = vsel %vm241_vm5, %v1043_v30, %v1013_v44  ;;  %v1070_v37 = vsel %vm244_vm6, %v3631_v13, %v1049_v59  ;;  %v4461_v18 = vld [vmem:[#allocation83_spill] sm:$0xff] }
 0x191   : > { %v1379_v53 = vsub.f32 %v1367_v54, %v3367_v50  ;;  %v1392_v61 = vadd.f32 0.0729, %v1380_v58  ;;  %v1359_v14 = vadd.f32 %v1095_v55, %v3585_v48  ;;  %v1372_v0 = vmul.f32 9.0, %v1360_v41 }
 0x192   : > { %v1377_v62 = vsub.f32 %v1365_v51, %v3376_v52  ;;  %v1390_v1 = vadd.f32 0.0729, %v1378_v10  ;;  %v1081_v42 = vadd.f32 %v1057_v57, %v4460_v27  ;;  %v1094_v43 = vadd.f32 %v1082_v31, %v1070_v37  ;;  %v3715_v56 = vpop.permute.xlu1 %1103  ;;  %v4462_v51 = vld [vmem:[#allocation77_spill] sm:$0xff] }
 0x193   : > { %v1391_v35 = vadd.f32 0.0729, %v1379_v53  ;;  %v3717_v44 = vmul.f32 %v1392_v61, %v1344_v8  ;;  %v1371_v19 = vmul.f32 9.0, %v1359_v14  ;;  %v1384_v13 = vsub.f32 %v1372_v0, %v3427_v38  ;;  %v3720_v60 = vpop.permute.xlu0 %1101  ;;  %v4463_v0 = vld [vmem:[#allocation22_spill] sm:$0xff] }
 0x194   : > { %v1389_v50 = vadd.f32 0.0729, %v1377_v62  ;;  %v3722_v12 = vmul.f32 %v1390_v1, %v1342_v3  ;;  %v1093_v48 = vadd.f32 %v1081_v42, %v1043_v30  ;;  %v1358_v52 = vadd.f32 %v1094_v43, %v3587_v25  ;;  %v4464_v43 = vld [vmem:[#allocation78_spill] sm:$0xff] }
 0x195   : > { %v1348_v16 = vadd.f32 0.0081, %v3427_v38  ;;  %v3727_v31 = vmul.f32 %v1391_v35, %v3657_v21  ;;  %v1383_v39 = vsub.f32 %v1371_v19, %v3430_v45  ;;  %v1396_v8 = vadd.f32 0.0729, %v1384_v13 }
 0x196   : > { %v3731_v23 = vmul.f32 %v1389_v50, %v3660_v40  ;;  %v1357_v5 = vadd.f32 %v1093_v48, %v3593_v33  ;;  %v1370_v47 = vmul.f32 9.0, %v1358_v52  ;;  %v3734_v20 = vpop.permute.xlu1 %1107  ;;  %v1347_v3 = vadd.f32 0.0081, %v3430_v45 }
 0x197   : > { %v1395_v26 = vadd.f32 0.0729, %v1383_v39  ;;  %v3737_v25 = vmul.f32 %v1396_v8, %v1348_v16  ;;  %v1046_v38 = vsel %vm680_vm7, %v3651_v9, %v1040_v11  ;;  %v3742_v21 = vpop.permute.xlu0 %1105  ;;  %v1088_v40 = vadd.f32 %v3637_v17, %v4461_v18  ;;  %v4465_v39 = vld [vmem:[#allocation40_spill] sm:$0xff] }
 0x198   : > { %v1369_v2 = vmul.f32 9.0, %v1357_v5  ;;  %v1382_v33 = vsub.f32 %v1370_v47, %v3447_v24  ;;  %v1052_v30 = vsel %vm680_vm7, %v1040_v11, %v3651_v9  ;;  %v1346_v45 = vadd.f32 0.0081, %v3447_v24 }
 0x199   : > { %v3751_v59 = vmul.f32 %v1395_v26, %v1347_v3  ;;  %v1063_v54 = vsel %vm241_vm5, %v1046_v38, %v3641_v32  ;;  %v1076_v58 = vsel %vm244_vm6, %v3637_v17, %v1052_v30  ;;  %v1345_v24 = vadd.f32 0.0081, %v3445_v49 }
 0x19a   : > { %v1381_v55 = vsub.f32 %v1369_v2, %v3445_v49  ;;  %v1394_v41 = vadd.f32 0.0729, %v1382_v33  ;;  %v1087_v10 = vadd.f32 %v1063_v54, %v4462_v51  ;;  %v1100_v57 = vadd.f32 %v1088_v40, %v1076_v58  ;;  %v3761_v37 = vpop.permute.xlu1 %1111  ;;  %v4466_v40 = vld [vmem:[#allocation30_spill] sm:$0xff] }
 0x19b   : > { %v1045_v9 = vsel %vm680_vm7, %v3653_v29, %v1038_v36  ;;  %v1051_v32 = vsel %vm680_vm7, %v1038_v36, %v3653_v29  ;;  %v3770_v11 = vpop.permute.xlu0 %1109  ;;  %v1086_v62 = vadd.f32 %v3645_v6, %v4463_v0  ;;  %v1351_v3 = vadd.f32 0.0081, %v3462_v15  ;;  %v4471_v0 = vld [vmem:[#allocation41_spill] sm:$0xff] }
 0x19c   : > { %v1393_v17 = vadd.f32 0.0729, %v1381_v55  ;;  %v3772_v53 = vmul.f32 %v1394_v41, %v1346_v45  ;;  %v1099_v61 = vadd.f32 %v1087_v10, %v1046_v38  ;;  %v1364_v14 = vadd.f32 %v1100_v57, %v3602_v46  ;;  %v4468_v10 = vld [vmem:[#allocation60_spill] sm:$0xff] }
 0x19d   : > { %v1061_v49 = vsel %vm241_vm5, %v1045_v9, %v3649_v63  ;;  %v1074_v1 = vsel %vm244_vm6, %v3645_v6, %v1051_v32  ;;  %v1352_v6 = vadd.f32 0.0081, %v3464_v7  ;;  %v3807_v57 = vadd.f32 %v4468_v10, %v4468_v10  ;;  %v4469_v32 = vld [vmem:[#allocation24_spill] sm:$0xff]  ;;  %v4480_v10 = vld [vmem:[#allocation67_spill] sm:$0xff] }
 0x19e   : > { %v3783_v29 = vmul.f32 %v1393_v17, %v1345_v24  ;;  %v1363_v36 = vadd.f32 %v1099_v61, %v3611_v4  ;;  %v1376_v27 = vmul.f32 9.0, %v1364_v14  ;;  %v3786_v42 = vpop.permute.xlu1 %1115  ;;  %v1085_v46 = vadd.f32 %v1061_v49, %v4464_v43  ;;  %v4470_v61 = vld [vmem:[#allocation31_spill] sm:$0xff] }
 0x19f   : > { %v1098_v35 = vadd.f32 %v1086_v62, %v1074_v1  ;;  %v3813_v17 = vadd.f32 %v4469_v32, %v4469_v32  ;;  %v3817_v14 = vadd.f32 %v4470_v61, %v4470_v61  ;;  %v3821_v62 = vadd.f32 %v4471_v0, %v4471_v0  ;;  %v4472_v49 = vld [vmem:[#allocation39_spill] sm:$0xff] }
 0x1a0   : > { %v3789_v19 = vpop.permute.xlu0 %1113  ;;  %v1375_v13 = vmul.f32 9.0, %v1363_v36  ;;  %v1388_v50 = vsub.f32 %v1376_v27, %v3464_v7  ;;  %v1097_v63 = vadd.f32 %v1085_v46, %v1045_v9  ;;  %v4467_v7 = vld [vmem:[#allocation44_spill] sm:$0xff]  ;;  %v3825_v1 = vadd.f32 %v4472_v49, %v4472_v49  ;;  %v4473_v36 = vld [vmem:[#allocation59_spill] sm:$0xff] }
 0x1a1   : > { %v1362_v48 = vadd.f32 %v1098_v35, %v3613_v28  ;;  %v1350_v28 = vadd.f32 0.0081, %v4466_v40  ;;  %v1349_v55 = vadd.f32 0.0081, %v4467_v7  ;;  %v3829_v27 = vadd.f32 %v4473_v36, %v4473_v36  ;;  %v4474_v35 = vld [vmem:[#allocation46_spill] sm:$0xff]  ;;  %v4482_v36 = vld [vmem:[#allocation12_spill] sm:$0xff] }
 0x1a2   : > { %v1387_v52 = vsub.f32 %v1375_v13, %v3462_v15  ;;  %v1400_v16 = vadd.f32 0.0729, %v1388_v50  ;;  %v1120_v4 = vpop.permute.xlu1 %1119  ;;  %v1361_v8 = vadd.f32 %v1097_v63, %v4465_v39  ;;  %1689 = vrcp.f32 %v3717_v44  ;;  %v4475_v50 = vld [vmem:[#allocation38_spill] sm:$0xff]  ;;  %v4476_v39 = vld [vmem:[#allocation48_spill] sm:$0xff] }
 0x1a3   : > { %v1374_v5 = vmul.f32 9.0, %v1362_v48  ;;  %1691 = vrcp.f32 %v3722_v12  ;;  %v3836_v46 = vadd.f32 0.0081, %v3807_v57  ;;  %v3840_v13 = vadd.f32 %v4474_v35, %v4474_v35 }
 0x1a4   : > { %v1118_v47 = vpop.permute.xlu0 %1117  ;;  %v1399_v26 = vadd.f32 0.0729, %v1387_v52  ;;  %v1412_v38 = vmul.f32 %v1400_v16, %v1352_v6  ;;  %v1373_v18 = vmul.f32 9.0, %v1361_v8  ;;  %v3844_v63 = vadd.f32 %v4475_v50, %v4475_v50 }
 0x1a5   : > { %v1386_v2 = vsub.f32 %v1374_v5, %v4466_v40  ;;  %1693 = vrcp.f32 %v3727_v31  ;;  %v3850_v44 = vadd.f32 0.0081, %v3813_v17  ;;  %v3853_v12 = vadd.f32 0.0081, %v3817_v14  ;;  %v4477_v40 = vld [vmem:[#allocation36_spill] sm:$0xff] }
 0x1a6   : > { %v1411_v33 = vmul.f32 %v1399_v26, %v1351_v3  ;;  %v1124_v30 = vpop.permute.xlu1 %1123  ;;  %v1385_v45 = vsub.f32 %v1373_v18, %v4467_v7  ;;  %v3856_v6 = vadd.f32 0.0081, %v3821_v62  ;;  %1695 = vrcp.f32 %v3731_v23  ;;  %v4478_v7 = vld [vmem:[#allocation19_spill] sm:$0xff] }
 0x1a7   : > { %v1398_v54 = vadd.f32 0.0729, %v1386_v2  ;;  %v3860_v52 = vadd.f32 0.0081, %v3825_v1  ;;  %v3863_v16 = vadd.f32 0.0081, %v3829_v27  ;;  %1697 = vrcp.f32 %v3737_v25 }
 0x1a8   : > { %v3800_v58 = vpop.permute.xlu0 %1121  ;;  %v1397_v41 = vadd.f32 0.0729, %v1385_v45  ;;  %v1126_v31 = vsel %vm643_vm4, %v3715_v56, %v3786_v42  ;;  %v3872_v8 = vadd.f32 %v4476_v39, %v4476_v39  ;;  %1699 = vrcp.f32 %v3751_v59 }
 0x1a9   : > { %v3803_v51 = vmul.f32 %v1398_v54, %v1350_v28  ;;  %v1125_v23 = vsel %vm643_vm4, %v3720_v60, %v3789_v19  ;;  %v1128_v25 = vsel %vm643_vm4, %v3734_v20, %v1120_v4  ;;  %v3885_v3 = vadd.f32 0.0081, %v3840_v13  ;;  %v4479_v54 = vld [vmem:[#allocation13_spill] sm:$0xff] }
 0x1aa   : > { %v3809_v24 = vmul.f32 %v1397_v41, %v1349_v55  ;;  %v3888_v26 = vadd.f32 0.0081, %v3844_v63  ;;  %1701 = vrcp.f32 %v3772_v53  ;;  %v3894_v59 = vsel %vm643_vm4, %v3742_v21, %v1118_v47 }
 0x1ab   : > { %v1140_v15 = vpop.permute.xlu1 %1139  ;;  %v3900_v2 = vadd.f32 %v4477_v40, %v4477_v40  ;;  %1703 = vrcp.f32 %v3783_v29  ;;  %v1132_v28 = vsel %vm643_vm4, %v3786_v42, %v3715_v56  ;;  %v1200_v53 = vadd.f32 %v1126_v31, %v4478_v7  ;;  %v4481_v42 = vld [vmem:[#allocation53_spill] sm:$0xff]  ;;  %v4484_v7 = vld [vmem:[#allocation15_spill] sm:$0xff] }
 0x1ac   : > { %v1138_v9 = vpop.permute.xlu0 %1137  ;;  %v1131_v45 = vsel %vm643_vm4, %v3789_v19, %v3720_v60  ;;  %v1198_v55 = vadd.f32 %v1125_v23, %v4479_v54  ;;  %v1134_v41 = vsel %vm643_vm4, %v1120_v4, %v3734_v20  ;;  %v1204_v29 = vadd.f32 %v1128_v25, %v4480_v10  ;;  %v1690_v61 = vpop.eup %1689 }
 0x1ad   : > { %1705 = vrcp.f32 %v1412_v38  ;;  %v1133_v56 = vsel %vm643_vm4, %v1118_v47, %v3742_v21  ;;  %v3922_v32 = vadd.f32 %v3894_v59, %v4481_v42  ;;  %v3927_v60 = vsel %vm643_vm4, %v3761_v37, %v1124_v30  ;;  %v1692_v38 = vpop.eup %1691 }
 0x1ae   : > { %1707 = vrcp.f32 %v1411_v33  ;;  %v3932_v20 = vsel %vm643_vm4, %v1124_v30, %v3761_v37 }
 0x1af   : > { %v3833_v43 = vpop.permute.xlu1 %1143  ;;  %v1694_v30 = vpop.eup %1693  ;;  %1709 = vrcp.f32 %v3803_v51  ;;  %v4489_v51 = vld [vmem:[#allocation54_spill] sm:$0xff] }
 0x1b0   : > { %v3847_v48 = vpop.permute.xlu0 %1141  ;;  %v1696_v40 = vpop.eup %1695  ;;  %1711 = vrcp.f32 %v3809_v24 }
 0x1b1   : > { %v1698_v42 = vpop.eup %1697 }
 0x1b3   : > { %v3882_v5 = vpop.permute.xlu1 %1147 }
 0x1b4   : > { %v3896_v18 = vpop.permute.xlu0 %1145 }
 0x1b7   : > { %v1152_v19 = vpop.permute.xlu1 %1151 }
 0x1b8   : > { %v1162_v21 = vsel %vm680_vm7, %v1140_v15, %v1152_v19  ;;  %v1168_v4 = vsel %vm680_vm7, %v1152_v19, %v1140_v15  ;;  %v1150_v47 = vpop.permute.xlu0 %1149 }
 0x1b9   : > { %v1175_v0 = vsel %vm241_vm5, %v1162_v21, %v1132_v28  ;;  %v1188_v49 = vsel %vm244_vm6, %v1126_v31, %v1168_v4  ;;  %v1161_v33 = vsel %vm680_vm7, %v1138_v9, %v1150_v47  ;;  %v1167_v37 = vsel %vm680_vm7, %v1150_v47, %v1138_v9  ;;  %v4483_v28 = vld [vmem:[#allocation55_spill] sm:$0xff] }
 0x1ba   : > { %v1199_v35 = vadd.f32 %v1175_v0, %v4482_v36  ;;  %v1212_v50 = vadd.f32 %v1200_v53, %v1188_v49  ;;  %v1173_v15 = vsel %vm241_vm5, %v1161_v33, %v1131_v45  ;;  %v1186_v39 = vsel %vm244_vm6, %v1125_v23, %v1167_v37  ;;  %v1700_v0 = vpop.eup %1699 }
 0x1bb   : > { %v3953_v31 = vadd.f32 %v3927_v60, %v4483_v28  ;;  %v3959_v9 = vsel %vm643_vm4, %v3770_v11, %v3800_v58  ;;  %v1197_v54 = vadd.f32 %v1173_v15, %v4484_v7  ;;  %v1210_v53 = vadd.f32 %v1198_v55, %v1186_v39  ;;  %v1156_v10 = vpop.permute.xlu1 %1155  ;;  %v4485_v15 = vld [vmem:[#allocation11_spill] sm:$0xff] }
 0x1bc   : > { %v1211_v45 = vadd.f32 %v1199_v35, %v1162_v21  ;;  %v1296_v19 = vmul.f32 18.0, %v1212_v50  ;;  %v1164_v23 = vsel %vm680_vm7, %v3833_v43, %v1156_v10  ;;  %v1170_v4 = vsel %vm680_vm7, %v1156_v10, %v3833_v43  ;;  %v1154_v47 = vpop.permute.xlu0 %1153  ;;  %v3972_v21 = vpop.eup %1701 }
 0x1bd   : > { %v1209_v49 = vadd.f32 %v1197_v54, %v1161_v33  ;;  %v1294_v37 = vmul.f32 18.0, %v1210_v53  ;;  %v1179_v36 = vsel %vm241_vm5, %v1164_v23, %v1134_v41  ;;  %v1192_v55 = vsel %vm244_vm6, %v1128_v25, %v1170_v4  ;;  %v3976_v7 = vpop.eup %1703 }
 0x1be   : > { %v1295_v35 = vmul.f32 18.0, %v1211_v45  ;;  %v1308_v50 = vsub.f32 %v1296_v19, %v3807_v57  ;;  %v1203_v39 = vadd.f32 %v1179_v36, %v4485_v15  ;;  %v1216_v28 = vadd.f32 %v1204_v29, %v1192_v55  ;;  %v3986_v45 = vpop.eup %1705 }
 0x1bf   : > { %v1293_v43 = vmul.f32 18.0, %v1209_v49  ;;  %v1306_v33 = vsub.f32 %v1294_v37, %v3821_v62  ;;  %v1163_v41 = vsel %vm680_vm7, %v3847_v48, %v1154_v47  ;;  %v1169_v25 = vsel %vm680_vm7, %v1154_v47, %v3847_v48  ;;  %v3994_v49 = vpop.eup %1707 }
 0x1c0   : > { %v1307_v54 = vsub.f32 %v1295_v35, %v3813_v17  ;;  %v1320_v53 = vadd.f32 0.0729, %v1308_v50  ;;  %v1215_v57 = vadd.f32 %v1203_v39, %v1164_v23  ;;  %v1300_v10 = vmul.f32 18.0, %v1216_v28 }
 0x1c1   : > { %v1305_v29 = vsub.f32 %v1293_v43, %v3817_v14  ;;  %v1318_v19 = vadd.f32 0.0729, %v1306_v33  ;;  %v1177_v62 = vsel %vm241_vm5, %v1163_v41, %v1133_v56  ;;  %v1190_v4 = vsel %vm244_vm6, %v3894_v59, %v1169_v25  ;;  %v4486_v14 = vld [vmem:[#allocation37_spill] sm:$0xff] }
 0x1c2   : > { %v1319_v48 = vadd.f32 0.0729, %v1307_v54  ;;  %v1332_v17 = vmul.f32 %v1320_v53, %v3836_v46  ;;  %v1299_v47 = vmul.f32 18.0, %v1215_v57  ;;  %v1312_v23 = vsub.f32 %v1300_v10, %v3829_v27 }
 0x1c3   : > { %v1317_v37 = vadd.f32 0.0729, %v1305_v29  ;;  %v1330_v36 = vmul.f32 %v1318_v19, %v3856_v6  ;;  %v1201_v55 = vadd.f32 %v1177_v62, %v4486_v14  ;;  %v1214_v35 = vadd.f32 %v3922_v32, %v1190_v4 }
 0x1c4   : > { %v1331_v56 = vmul.f32 %v1319_v48, %v3850_v44  ;;  %v1420_v50 = vmul.f32 %v1690_v61, %v1332_v17  ;;  %v1311_v59 = vsub.f32 %v1299_v47, %v3825_v1  ;;  %v1324_v15 = vadd.f32 0.0729, %v1312_v23  ;;  %v1160_v17 = vpop.permute.xlu1 %1159 }
 0x1c5   : > { %v1329_v39 = vmul.f32 %v1317_v37, %v3853_v12  ;;  %v1416_v28 = vmul.f32 %v1692_v38, %v1330_v36  ;;  %v1213_v46 = vadd.f32 %v1201_v55, %v1163_v41  ;;  %v1298_v43 = vmul.f32 18.0, %v1214_v35 }
 0x1c6   : > { %v1418_v33 = vmul.f32 %v1694_v30, %v1331_v56  ;;  %v1440_v27 = vmul.f32 0.5, %v1420_v50  ;;  %v1323_v25 = vadd.f32 0.0729, %v1311_v59  ;;  %v1336_v6 = vmul.f32 %v1324_v15, %v3863_v16  ;;  %v1158_v59 = vpop.permute.xlu0 %1157 }
 0x1c7   : > { %v1414_v54 = vmul.f32 %v1696_v40, %v1329_v39  ;;  %v1438_v53 = vmul.f32 0.5, %v1416_v28  ;;  %v1297_v57 = vmul.f32 18.0, %v1213_v46  ;;  %v1310_v32 = vsub.f32 %v1298_v43, %v3844_v63 }
 0x1c8   : > { %v1439_v44 = vmul.f32 0.5, %v1418_v33  ;;  %v1452_v61 = vsub.f32 0.5, %v1440_v27  ;;  %v1335_v1 = vmul.f32 %v1323_v25, %v3860_v52  ;;  %v1428_v10 = vmul.f32 %v1698_v42, %v1336_v6  ;;  %v4487_v33 = vld [vmem:[#allocation14_spill] sm:$0xff] }
 0x1c9   : > { %v1437_v29 = vmul.f32 0.5, %v1414_v54  ;;  %v1450_v12 = vsub.f32 0.5, %v1438_v53  ;;  %v1309_v38 = vsub.f32 %v1297_v57, %v3840_v13  ;;  %v1322_v41 = vadd.f32 0.0729, %v1310_v32  ;;  %v4488_v32 = vld [vmem:[#allocation18_spill] sm:$0xff] }
 0x1ca   : > { %v1451_v30 = vsub.f32 0.5, %v1439_v44  ;;  %v1464_v19 = vmax.f32 %v1452_v61, 0.0  ;;  %v1426_v62 = vmul.f32 %v1700_v0, %v1335_v1  ;;  %v1444_v16 = vmul.f32 0.5, %v1428_v10 }
 0x1cb   : > { %v1449_v40 = vsub.f32 0.5, %v1437_v29  ;;  %v1462_v4 = vmax.f32 %v1450_v12, 0.0  ;;  %v1321_v48 = vadd.f32 0.0729, %v1309_v38  ;;  %v1334_v63 = vmul.f32 %v1322_v41, %v3888_v26 }
 0x1cc   : > { %v1463_v47 = vmax.f32 %v1451_v30, 0.0  ;;  %v1476_v23 = vmin.f32 %v1464_v19, 1.0  ;;  %v1443_v52 = vmul.f32 0.5, %v1426_v62  ;;  %v1456_v42 = vsub.f32 0.5, %v1444_v16 }
 0x1cd   : > { %v1461_v37 = vmax.f32 %v1449_v40, 0.0  ;;  %v1474_v36 = vmin.f32 %v1462_v4, 1.0  ;;  %v1333_v13 = vmul.f32 %v1321_v48, %v3885_v3  ;;  %v1424_v14 = vmul.f32 %v3972_v21, %v1334_v63  ;;  %v4491_v4 = vld [vmem:[#allocation62_spill] sm:$0xff] }
 0x1ce   : > { %v1475_v55 = vmin.f32 %v1463_v47, 1.0  ;;  %1488 = vst [vmem:[%s4012_s5 + $0x18] sm:$0xff] %v1476_v23  ;;  %v1455_v26 = vsub.f32 0.5, %v1443_v52  ;;  %v1468_v0 = vmax.f32 %v1456_v42, 0.0  ;;  %v1166_v35 = vsel %vm680_vm7, %v3882_v5, %v1160_v17 }
 0x1cf   : > { %v1473_v56 = vmin.f32 %v1461_v37, 1.0  ;;  %1486 = vst [vmem:[%s4012_s5 + $0x8] sm:$0xff] %v1474_v36  ;;  %v1422_v3 = vmul.f32 %v3976_v7, %v1333_v13  ;;  %v1442_v21 = vmul.f32 0.5, %v1424_v14  ;;  %v1172_v50 = vsel %vm680_vm7, %v1160_v17, %v3882_v5  ;;  %v1710_v13 = vpop.eup %1709 }
 0x1d0   : > { %1487 = vst [vmem:[%s4012_s5 + $0x10] sm:$0xff] %v1475_v55  ;;  %v1467_v15 = vmax.f32 %v1455_v26, 0.0  ;;  %v1480_v39 = vmin.f32 %v1468_v0, 1.0  ;;  %v1183_v28 = vsel %vm241_vm5, %v1166_v35, %v3932_v20  ;;  %v1196_v46 = vsel %vm244_vm6, %v3927_v60, %v1172_v50 }
 0x1d1   : > { %1485 = vst [vmem:[%s4012_s5] sm:$0xff] %v1473_v56  ;;  %v1441_v7 = vmul.f32 0.5, %v1422_v3  ;;  %v1454_v43 = vsub.f32 0.5, %v1442_v21  ;;  %v1207_v27 = vadd.f32 %v1183_v28, %v4487_v33  ;;  %v1220_v5 = vadd.f32 %v3953_v31, %v1196_v46  ;;  %v1712_v3 = vpop.eup %1711 }
 0x1d2   : > { %v1135_v25 = vsel %vm643_vm4, %v3800_v58, %v3770_v11  ;;  %v1479_v6 = vmin.f32 %v1467_v15, 1.0  ;;  %1492 = vst [vmem:[%s4012_s5 + $0x38] sm:$0xff] %v1480_v39  ;;  %v1165_v20 = vsel %vm680_vm7, %v3896_v18, %v1158_v59  ;;  %v1171_v60 = vsel %vm680_vm7, %v1158_v59, %v3896_v18 }
 0x1d3   : > { %v1453_v54 = vsub.f32 0.5, %v1441_v7  ;;  %v1466_v53 = vmax.f32 %v1454_v43, 0.0  ;;  %v1219_v57 = vadd.f32 %v1207_v27, %v1166_v35  ;;  %v1304_v31 = vmul.f32 18.0, %v1220_v5 }
 0x1d4   : > { %v1206_v11 = vadd.f32 %v3959_v9, %v4488_v32  ;;  %1491 = vst [vmem:[%s4012_s5 + $0x30] sm:$0xff] %v1479_v6  ;;  %v1181_v58 = vsel %vm241_vm5, %v1165_v20, %v1135_v25  ;;  %v1194_v44 = vsel %vm244_vm6, %v3959_v9, %v1171_v60  ;;  %v1292_v29 = vadd.f32 0.0081, %v3872_v8 }
 0x1d5   : > { %v1465_v61 = vmax.f32 %v1453_v54, 0.0  ;;  %v1478_v18 = vmin.f32 %v1466_v53, 1.0  ;;  %v1303_v1 = vmul.f32 18.0, %v1219_v57  ;;  %v1316_v10 = vsub.f32 %v1304_v31, %v3872_v8 }
 0x1d6   : > { %v1205_v12 = vadd.f32 %v1181_v58, %v4489_v51  ;;  %v1218_v38 = vadd.f32 %v1206_v11, %v1194_v44  ;;  %v1242_v9 = vadd.f32 %v4490_v22, %v4490_v22  ;;  %v1291_v16 = vadd.f32 0.0081, %v3900_v2 }
 0x1d7   : > { %v1477_v41 = vmin.f32 %v1465_v61, 1.0  ;;  %1490 = vst [vmem:[%s4012_s5 + $0x28] sm:$0xff] %v1478_v18  ;;  %v1315_v34 = vsub.f32 %v1303_v1, %v3900_v2  ;;  %v1328_v30 = vadd.f32 0.0729, %v1316_v10  ;;  %v1241_v48 = vadd.f32 %v4491_v4, %v4491_v4 }
 0x1d8   : > { %v1217_v19 = vadd.f32 %v1205_v12, %v1165_v20  ;;  %v1302_v62 = vmul.f32 18.0, %v1218_v38  ;;  %v1290_v23 = vadd.f32 0.0081, %v1242_v9 }
 0x1d9   : > { %1489 = vst [vmem:[%s4012_s5 + $0x20] sm:$0xff] %v1477_v41  ;;  %v1327_v40 = vadd.f32 0.0729, %v1315_v34  ;;  %v1340_v8 = vmul.f32 %v1328_v30, %v1292_v29  ;;  %v1289_v14 = vadd.f32 0.0081, %v1241_v48 }
 0x1da   : > { %v1301_v63 = vmul.f32 18.0, %v1217_v19  ;;  %v1314_v24 = vsub.f32 %v1302_v62, %v1242_v9 }
 0x1db   : > { %v1339_v17 = vmul.f32 %v1327_v40, %v1291_v16  ;;  %v1436_v47 = vmul.f32 %v3986_v45, %v1340_v8 }
 0x1dc   : > { %v1313_v52 = vsub.f32 %v1301_v63, %v1241_v48  ;;  %v1326_v42 = vadd.f32 0.0729, %v1314_v24 }
 0x1dd   : > { %v1434_v37 = vmul.f32 %v3994_v49, %v1339_v17  ;;  %v1448_v36 = vmul.f32 0.5, %v1436_v47 }
 0x1de   : > { %v1325_v2 = vadd.f32 0.0729, %v1313_v52  ;;  %v1338_v55 = vmul.f32 %v1326_v42, %v1290_v23 }
 0x1df   : > { %v1447_v26 = vmul.f32 0.5, %v1434_v37  ;;  %v1460_v0 = vsub.f32 0.5, %v1448_v36 }
 0x1e0   : > { %v1337_v35 = vmul.f32 %v1325_v2, %v1289_v14  ;;  %v1432_v56 = vmul.f32 %v1710_v13, %v1338_v55 }
 0x1e1   : > { %v1459_v45 = vsub.f32 0.5, %v1447_v26  ;;  %v1472_v21 = vmax.f32 %v1460_v0, 0.0 }
 0x1e2   : > { %v1430_v50 = vmul.f32 %v1712_v3, %v1337_v35  ;;  %v1446_v59 = vmul.f32 0.5, %v1432_v56 }
 0x1e3   : > { %v1471_v15 = vmax.f32 %v1459_v45, 0.0  ;;  %v1484_v49 = vmin.f32 %v1472_v21, 1.0 }
 0x1e4   : > { %v1445_v39 = vmul.f32 0.5, %v1430_v50  ;;  %v1458_v28 = vsub.f32 0.5, %v1446_v59 }
 0x1e5   : > { %v1483_v46 = vmin.f32 %v1471_v15, 1.0  ;;  %1496 = vst [vmem:[%s4012_s5 + $0x58] sm:$0xff] %v1484_v49 }
 0x1e6   : > { %v1457_v7 = vsub.f32 0.5, %v1445_v39  ;;  %v1470_v43 = vmax.f32 %v1458_v28, 0.0 }
 0x1e7   : > { %1495 = vst [vmem:[%s4012_s5 + $0x50] sm:$0xff] %v1483_v46 }
 0x1e8   : > { %v1469_v33 = vmax.f32 %v1457_v7, 0.0  ;;  %v1482_v27 = vmin.f32 %v1470_v43, 1.0 }
 0x1ea   : > { %v1481_v5 = vmin.f32 %v1469_v33, 1.0  ;;  %1494 = vst [vmem:[%s4012_s5 + $0x48] sm:$0xff] %v1482_v27 }
 0x1ec   : > { %1493 = vst [vmem:[%s4012_s5 + $0x40] sm:$0xff] %v1481_v5 }
 0x1ed   : > { %1786 = shalt.err (!%p1783_p11)
}
 0x1ee   : > { %s1787_s14 = scalar_lea.hbm %s4074_s25, 1536  ;;  %s1791_s17 = scalar_lea.hbm %s4124_s2, 3072 }
 0x1ef   : > { %p1788_p3 = scmp.ne.s32.totalorder %s4074_s25, %s1787_s14  ;;  %p1792_p2 = scmp.lt.u32.totalorder %s4074_s25, %s4124_s2 }
 0x1f0   : > { %p1793_p4 = scmp.lt.u32.totalorder %s1791_s17, %s1787_s14  ;;  %p1795_p13 = scmp.lt.u32.totalorder %s1787_s14, %s4074_s25 }
 0x1f1   : > { %p1789_p8 = pnand %p1788_p3, %p4492_p1 }
 0x1f2   : > { %p1794_p6 = por %p1793_p4, %p1792_p2 }
 0x1f3   : > { %p1790_p0 = pneg %p1789_p8 }
 0x1f4   : > { %p1796_p12 = por %p1795_p13, %p1794_p6 }
 0x1f6   : > { %p1797_p10 = pnand %p1796_p12, %p1790_p0 }
 0x1f8   : > { %1800 = shalt.err (!%p1797_p10)
}
 0x1f9   : > { %s1852_s19 = smov 256   ;;  %s1853_s4 = smov 16  }
 0x1fa   : > { %1636 = dma.vmem_to_hbm [thread:$0]  (%p4492_p1), %s4076_s16, 1536, %s4074_s25, %s1498_s13, %s1852_s19, %s1852_s19, %s1853_s4  }
 0x1fb PF: > { %s1527_s5 = sand.u32 1, %s1831_s9   ;;  %p4493_p5 = scmp.ne.s32.totalorder %s4251_s21, 0 }
 0x1fc   : > { %p4494_p7 = scmp.ge.s32.totalorder %s1843_s12, 2  ;;  %s1528_s8 = scalar_lea.sflag [#allocation4], %s1527_s5 }
 0x1fe   : > { %p1646_p9 = pnand %p4494_p7, %p4493_p5 }
 0x200   : > { %1826 = dma.done.wait (!%p1646_p9), %s1528_s8, 1536  }
 0x201   : > { %1828 = vsyncadd (!%p1646_p9), %s1528_s8, 4294965760  ;;  %p18_p11 = scmp.ge.s32.totalorder %s1894_s15, 4   ;;  %s4495_s9 = smov %s1835_s10 }
 0x202   : > { %s4496_s10 = smov %s1839_s11  ;;  %s4497_s11 = smov %s1906_s18 }
 0x203   : > { %s4498_s12 = smov %s1894_s15  ;;  %20 = sbr.rel (!%p18_p11) target bundleno = 7 (0x7), region = 86 }
 0x20a   :  { %1533 = vsyncpa [#allocation3], 1 }
 0x20b   :  { %1535 = vsyncpa [#allocation3 + $0x1], 1 }
 0x20c   :  { %1536 = vsyncpa [#allocation6], 1 }
 0x20d   :  { %1538 = vsyncpa [#allocation6 + $0x1], 1 }
 0x20e   :  { %1539 = vsyncpa [#allocation4], 1 }
 0x20f   :  { %1541 = vsyncpa [#allocation4 + $0x1], 1 }

</bundles_post_ra>
